<compile_context>
chip_gen: v6e
topology: v6e:2x2x1
jax: 0.10.0
libtpu: 0.0.40
codegen_flags: <defaults>
</compile_context>

<pallas_src>
import functools

import jax
import jax.numpy as jnp
from jax.experimental import pallas as pl
from jax.experimental.pallas import tpu as pltpu


def _resblock_kernel(x_ref, masks_ref,
                     s1_ref, o1_ref, w1_ref, b1_ref,
                     s2_ref, o2_ref, w2_ref, b2_ref,
                     wb_ref, bb_ref,
                     out_ref,
                     pad1_ref, pad2_ref,
                     *, img_w, margin, slope):
    """One grid step = one batch element, full (C, S=H*W) slab in VMEM."""
    S = x_ref.shape[2]

    def lrelu(v):
        return jnp.where(v >= 0, v, slope * v)

    def conv3x3(a, pad_ref, w_taps_ref, b_ref):
        # a: (Ci, S) f32.  w_taps_ref: (9, Co, Ci).  b_ref: (Co, 1).
        co = w_taps_ref.shape[1]
        # Park the activation in a zero-margined flat scratch:
        #   pad[:, margin + p] = a[:, p], everything outside [margin, margin+S) is 0,
        # so a window at offset `off` reads a[:, p + off] with zero padding for
        # out-of-range rows; column wraparound is removed by the masks.
        pad_ref[...] = jnp.zeros(pad_ref.shape, jnp.float32)
        pad_ref[:, margin:margin + S] = a
        acc = jnp.zeros((co, S), jnp.float32)
        for k in range(9):                                  # unrolled 3x3 taps
            dy, dx = k // 3 - 1, k % 3 - 1
            off = dy * img_w + dx
            shifted = pad_ref[:, margin + off:margin + off + S]   # (Ci, S)
            rhs = shifted * masks_ref[dx + 1]                     # kill col wrap
            acc = acc + jnp.dot(w_taps_ref[k], rhs,
                                preferred_element_type=jnp.float32)
        return acc + b_ref[...]

    x = x_ref[0].astype(jnp.float32)                              # (Cin, S)

    # Main branch: BN1 -> LeakyReLU -> conv3x3 -> BN2 -> LeakyReLU -> conv3x3.
    a1 = lrelu(x * s1_ref[...] + o1_ref[...])
    h1 = conv3x3(a1, pad1_ref, w1_ref, b1_ref)                    # (Ch, S)
    a2 = lrelu(h1 * s2_ref[...] + o2_ref[...])
    h2 = conv3x3(a2, pad2_ref, w2_ref, b2_ref)                    # (Cout, S)

    # Shortcut branch: 1x1 conv on the raw input.
    sc = jnp.dot(wb_ref[...], x, preferred_element_type=jnp.float32) + bb_ref[...]

    out_ref[0] = (h2 + sc).astype(out_ref.dtype)


def resblock_forward(x, p):
    """ResBlock forward (sample_type='none', no coord/spectral). x: (B,C,H,W)."""
    B, Cin, H, W = x.shape
    Ch = p["w1"].shape[0]
    Cout = p["w2"].shape[0]
    S = H * W
    eps = 1e-5
    f32 = jnp.float32

    # Lane-dense layout: flatten spatial dims (free reshape in XLA).
    x_flat = x.reshape(B, Cin, S)

    # Column-validity masks for horizontal tap offsets dx = -1, 0, +1
    # (batch-invariant; computed once here, not per grid step).
    ww = jnp.arange(S, dtype=jnp.int32) % W
    masks = jnp.stack([
        (ww >= 1).astype(f32),            # dx = -1
        jnp.ones((S,), f32),              # dx =  0
        (ww <= W - 2).astype(f32),        # dx = +1
    ], axis=0).reshape(3, 1, S)

    # Conv weights regrouped per 3x3 tap: (Co, Ci, 3, 3) -> (9, Co, Ci).
    w1_t = jnp.transpose(p["w1"], (2, 3, 0, 1)).reshape(9, Ch, Cin).astype(f32)
    w2_t = jnp.transpose(p["w2"], (2, 3, 0, 1)).reshape(9, Cout, Ch).astype(f32)
    wb = p["wb"].reshape(Cout, Cin).astype(f32)

    # Fold inference-mode BatchNorm into per-channel scale/offset.
    s1 = (p["bn1_gamma"] / jnp.sqrt(p["bn1_var"] + eps)).astype(f32)
    o1 = (p["bn1_beta"] - p["bn1_mean"] * s1).astype(f32)
    s2 = (p["bn2_gamma"] / jnp.sqrt(p["bn2_var"] + eps)).astype(f32)
    o2 = (p["bn2_beta"] - p["bn2_mean"] * s2).astype(f32)

    # Margin of the flat padded scratch, rounded up to a lane multiple so the
    # activation store stays lane-aligned (only the tap loads are shifted).
    margin = ((W + 1 + 127) // 128) * 128

    kernel = functools.partial(_resblock_kernel, img_w=W, margin=margin,
                               slope=0.01)

    grid_spec = pltpu.PrefetchScalarGridSpec(
        num_scalar_prefetch=0,
        grid=(B,),
        in_specs=[
            pl.BlockSpec((1, Cin, S), lambda b: (b, 0, 0)),     # x (flattened)
            pl.BlockSpec((3, 1, S), lambda b: (0, 0, 0)),       # column masks
            pl.BlockSpec((Cin, 1), lambda b: (0, 0)),           # bn1 scale
            pl.BlockSpec((Cin, 1), lambda b: (0, 0)),           # bn1 offset
            pl.BlockSpec((9, Ch, Cin), lambda b: (0, 0, 0)),    # conv1 taps
            pl.BlockSpec((Ch, 1), lambda b: (0, 0)),            # conv1 bias
            pl.BlockSpec((Ch, 1), lambda b: (0, 0)),            # bn2 scale
            pl.BlockSpec((Ch, 1), lambda b: (0, 0)),            # bn2 offset
            pl.BlockSpec((9, Cout, Ch), lambda b: (0, 0, 0)),   # conv2 taps
            pl.BlockSpec((Cout, 1), lambda b: (0, 0)),          # conv2 bias
            pl.BlockSpec((Cout, Cin), lambda b: (0, 0)),        # bypass weight
            pl.BlockSpec((Cout, 1), lambda b: (0, 0)),          # bypass bias
        ],
        out_specs=pl.BlockSpec((1, Cout, S), lambda b: (b, 0, 0)),
        scratch_shapes=[
            pltpu.VMEM((Cin, S + 2 * margin), jnp.float32),     # conv1 padded act
            pltpu.VMEM((Ch, S + 2 * margin), jnp.float32),      # conv2 padded act
        ],
    )

    out_flat = pl.pallas_call(
        kernel,
        out_shape=jax.ShapeDtypeStruct((B, Cout, S), x.dtype),
        grid_spec=grid_spec,
        compiler_params=pltpu.CompilerParams(
            dimension_semantics=("parallel",)),
    )(x_flat, masks,
      s1.reshape(Cin, 1), o1.reshape(Cin, 1), w1_t,
      p["b1"].reshape(Ch, 1).astype(f32),
      s2.reshape(Ch, 1), o2.reshape(Ch, 1), w2_t,
      p["b2"].reshape(Cout, 1).astype(f32),
      wb, p["bb"].reshape(Cout, 1).astype(f32))

    return out_flat.reshape(B, Cout, H, W)


def _reference_resblock(x, p):
    """Pure-JAX reference matching the PyTorch ResBlock forward (eval-mode BN)."""
    eps = 1e-5

    def bn(v, g, b, m, var):
        return ((v - m[None, :, None, None])
                / jnp.sqrt(var[None, :, None, None] + eps)
                * g[None, :, None, None] + b[None, :, None, None])

    def lrelu(v):
        return jnp.where(v >= 0, v, 0.01 * v)

    def conv(v, w, b, pad):
        out = jax.lax.conv_general_dilated(
            v, w, window_strides=(1, 1),
            padding=((pad, pad), (pad, pad)),
            dimension_numbers=("NCHW", "OIHW", "NCHW"),
            precision=jax.lax.Precision.HIGHEST)
        return out + b[None, :, None, None]

    h = lrelu(bn(x, p["bn1_gamma"], p["bn1_beta"], p["bn1_mean"], p["bn1_var"]))
    h = conv(h, p["w1"], p["b1"], 1)
    h = lrelu(bn(h, p["bn2_gamma"], p["bn2_beta"], p["bn2_mean"], p["bn2_var"]))
    h = conv(h, p["w2"], p["b2"], 1)
    s = conv(x, p["wb"], p["bb"], 0)
    return h + s


if __name__ == "__main__":
    key = jax.random.PRNGKey(0)
    keys = jax.random.split(key, 16)

    B, Cin, H, W = 2, 4, 16, 16
    Cout = 8
    Ch = Cout                      # hidden_nc defaults to output_nc

    x = jax.random.normal(keys[0], (B, Cin, H, W), dtype=jnp.float32)

    p = {
        "bn1_gamma": 1.0 + 0.1 * jax.random.normal(keys[1], (Cin,), jnp.float32),
        "bn1_beta": 0.1 * jax.random.normal(keys[2], (Cin,), jnp.float32),
        "bn1_mean": 0.1 * jax.random.normal(keys[3], (Cin,), jnp.float32),
        "bn1_var": jax.random.uniform(keys[4], (Cin,), jnp.float32, 0.5, 1.5),
        "w1": 0.1 * jax.random.normal(keys[5], (Ch, Cin, 3, 3), jnp.float32),
        "b1": 0.1 * jax.random.normal(keys[6], (Ch,), jnp.float32),
        "bn2_gamma": 1.0 + 0.1 * jax.random.normal(keys[7], (Ch,), jnp.float32),
        "bn2_beta": 0.1 * jax.random.normal(keys[8], (Ch,), jnp.float32),
        "bn2_mean": 0.1 * jax.random.normal(keys[9], (Ch,), jnp.float32),
        "bn2_var": jax.random.uniform(keys[10], (Ch,), jnp.float32, 0.5, 1.5),
        "w2": 0.1 * jax.random.normal(keys[11], (Cout, Ch, 3, 3), jnp.float32),
        "b2": 0.1 * jax.random.normal(keys[12], (Cout,), jnp.float32),
        "wb": 0.1 * jax.random.normal(keys[13], (Cout, Cin, 1, 1), jnp.float32),
        "bb": 0.1 * jax.random.normal(keys[14], (Cout,), jnp.float32),
    }

    out = resblock_forward(x, p)
    out = jax.block_until_ready(out)

    ref = _reference_resblock(x, p)
    assert out.shape == (B, Cout, H, W), out.shape
    max_err = float(jnp.max(jnp.abs(out - ref)))
    # Loose-ish tolerance: kernel matmuls run at the MXU's default f32 precision
    # (bf16 passes); structural bugs would produce errors orders of magnitude larger.
    assert max_err < 5e-2, f"mismatch vs reference: max abs err {max_err}"

    print("KERNEL_OK")
</pallas_src>

<mosaic_0001>
module attributes {stable_mosaic.version = 11 : i64} {
  func.func @_resblock_kernel(%arg0: i32, %arg1: memref<1x4x256xf32, #tpu.memory_space<vmem>>, %arg2: memref<3x1x256xf32, #tpu.memory_space<vmem>>, %arg3: memref<4x1xf32, #tpu.memory_space<vmem>>, %arg4: memref<4x1xf32, #tpu.memory_space<vmem>>, %arg5: memref<9x8x4xf32, #tpu.memory_space<vmem>>, %arg6: memref<8x1xf32, #tpu.memory_space<vmem>>, %arg7: memref<8x1xf32, #tpu.memory_space<vmem>>, %arg8: memref<8x1xf32, #tpu.memory_space<vmem>>, %arg9: memref<9x8x8xf32, #tpu.memory_space<vmem>>, %arg10: memref<8x1xf32, #tpu.memory_space<vmem>>, %arg11: memref<8x4xf32, #tpu.memory_space<vmem>>, %arg12: memref<8x1xf32, #tpu.memory_space<vmem>>, %arg13: memref<1x8x256xf32, #tpu.memory_space<vmem>>, %arg14: memref<4x512xf32, #tpu.memory_space<vmem>>, %arg15: memref<8x512xf32, #tpu.memory_space<vmem>>) attributes {dimension_semantics = [#tpu.dimension_semantics<parallel>], iteration_bounds = array<i64: 2>, scalar_prefetch = 0 : i64, scratch_operands = 2 : i64, tpu.core_type = #tpu.core_type<tc>, window_params = [{transform_indices = @transform_0, window_bounds = array<i64: 1, 4, 256>}, {pipeline_mode = #tpu.pipeline_mode<synchronous>, transform_indices = @transform_1, window_bounds = array<i64: 3, 1, 256>}, {pipeline_mode = #tpu.pipeline_mode<synchronous>, transform_indices = @transform_2, window_bounds = array<i64: 4, 1>}, {pipeline_mode = #tpu.pipeline_mode<synchronous>, transform_indices = @transform_3, window_bounds = array<i64: 4, 1>}, {pipeline_mode = #tpu.pipeline_mode<synchronous>, transform_indices = @transform_4, window_bounds = array<i64: 9, 8, 4>}, {pipeline_mode = #tpu.pipeline_mode<synchronous>, transform_indices = @transform_5, window_bounds = array<i64: 8, 1>}, {pipeline_mode = #tpu.pipeline_mode<synchronous>, transform_indices = @transform_6, window_bounds = array<i64: 8, 1>}, {pipeline_mode = #tpu.pipeline_mode<synchronous>, transform_indices = @transform_7, window_bounds = array<i64: 8, 1>}, {pipeline_mode = #tpu.pipeline_mode<synchronous>, transform_indices = @transform_8, window_bounds = array<i64: 9, 8, 8>}, {pipeline_mode = #tpu.pipeline_mode<synchronous>, transform_indices = @transform_9, window_bounds = array<i64: 8, 1>}, {pipeline_mode = #tpu.pipeline_mode<synchronous>, transform_indices = @transform_10, window_bounds = array<i64: 8, 4>}, {pipeline_mode = #tpu.pipeline_mode<synchronous>, transform_indices = @transform_11, window_bounds = array<i64: 8, 1>}, {transform_indices = @transform_12, window_bounds = array<i64: 1, 8, 256>}]} {
    %c0 = arith.constant 0 : index
    %c0_0 = arith.constant 0 : index
    %c0_1 = arith.constant 0 : index
    %0 = vector.load %arg1[%c0, %c0_0, %c0_1] : memref<1x4x256xf32, #tpu.memory_space<vmem>>, vector<1x4x256xf32>
    %1 = vector.shape_cast %0 : vector<1x4x256xf32> to vector<4x256xf32>
    %c0_2 = arith.constant 0 : index
    %c0_3 = arith.constant 0 : index
    %2 = vector.load %arg3[%c0_2, %c0_3] : memref<4x1xf32, #tpu.memory_space<vmem>>, vector<4x1xf32>
    %3 = vector.broadcast %2 : vector<4x1xf32> to vector<4x256xf32>
    %4 = arith.mulf %1, %3 : vector<4x256xf32>
    %c0_4 = arith.constant 0 : index
    %c0_5 = arith.constant 0 : index
    %5 = vector.load %arg4[%c0_4, %c0_5] : memref<4x1xf32, #tpu.memory_space<vmem>>, vector<4x1xf32>
    %6 = vector.broadcast %5 : vector<4x1xf32> to vector<4x256xf32>
    %7 = arith.addf %4, %6 : vector<4x256xf32>
    %cst = arith.constant 0.000000e+00 : f32
    %8 = vector.broadcast %cst : f32 to vector<4x256xf32>
    %9 = arith.cmpf oge, %7, %8 : vector<4x256xf32>
    %cst_6 = arith.constant 0.00999999977 : f32
    %10 = vector.broadcast %cst_6 : f32 to vector<4x256xf32>
    %11 = arith.mulf %10, %7 : vector<4x256xf32>
    %12 = arith.select %9, %7, %11 : vector<4x256xi1>, vector<4x256xf32>
    %cst_7 = arith.constant 0.000000e+00 : f32
    %13 = vector.broadcast %cst_7 : f32 to vector<4x512xf32>
    %c0_8 = arith.constant 0 : index
    %c0_9 = arith.constant 0 : index
    %14 = vector.load %arg14[%c0_8, %c0_9] : memref<4x512xf32, #tpu.memory_space<vmem>>, vector<4x512xf32>
    tpu.vector_store %arg14[%c0_8, %c0_9], %13 {strides = array<i32>} : memref<4x512xf32, #tpu.memory_space<vmem>>, vector<4x512xf32>,
    %c0_10 = arith.constant 0 : index
    %c128 = arith.constant 128 : index
    %15 = vector.load %arg14[%c0_10, %c128] : memref<4x512xf32, #tpu.memory_space<vmem>>, vector<4x256xf32>
    tpu.vector_store %arg14[%c0_10, %c128], %12 {strides = array<i32>} : memref<4x512xf32, #tpu.memory_space<vmem>>, vector<4x256xf32>,
    %cst_11 = arith.constant 0.000000e+00 : f32
    %16 = vector.broadcast %cst_11 : f32 to vector<8x256xf32>
    %c0_12 = arith.constant 0 : index
    %c111 = arith.constant 111 : index
    %17 = vector.load %arg14[%c0_12, %c111] : memref<4x512xf32, #tpu.memory_space<vmem>>, vector<4x256xf32>
    %c0_13 = arith.constant 0 : index
    %c0_14 = arith.constant 0 : index
    %c0_15 = arith.constant 0 : index
    %18 = vector.load %arg2[%c0_13, %c0_14, %c0_15] : memref<3x1x256xf32, #tpu.memory_space<vmem>>, vector<1x1x256xf32>
    %19 = vector.shape_cast %18 : vector<1x1x256xf32> to vector<1x256xf32>
    %20 = vector.broadcast %19 : vector<1x256xf32> to vector<4x256xf32>
    %21 = arith.mulf %17, %20 : vector<4x256xf32>
    %c0_16 = arith.constant 0 : index
    %c0_17 = arith.constant 0 : index
    %c0_18 = arith.constant 0 : index
    %22 = vector.load %arg5[%c0_16, %c0_17, %c0_18] : memref<9x8x4xf32, #tpu.memory_space<vmem>>, vector<1x8x4xf32>
    %23 = vector.shape_cast %22 : vector<1x8x4xf32> to vector<8x4xf32>
    %cst_19 = arith.constant dense<0.000000e+00> : vector<8x256xf32>
    %24 = tpu.matmul %23, %21, %cst_19 {dimension_numbers = #tpu.dot_dimension_numbers<[1], [0], [0], [1], [0, 0, 1, 1], [], []>} : vector<8x4xf32>, vector<4x256xf32>, vector<8x256xf32> -> vector<8x256xf32>
    %25 = arith.addf %16, %24 : vector<8x256xf32>
    %c0_20 = arith.constant 0 : index
    %c112 = arith.constant 112 : index
    %26 = vector.load %arg14[%c0_20, %c112] : memref<4x512xf32, #tpu.memory_space<vmem>>, vector<4x256xf32>
    %c1 = arith.constant 1 : index
    %c0_21 = arith.constant 0 : index
    %c0_22 = arith.constant 0 : index
    %27 = vector.load %arg2[%c1, %c0_21, %c0_22] : memref<3x1x256xf32, #tpu.memory_space<vmem>>, vector<1x1x256xf32>
    %28 = vector.shape_cast %27 : vector<1x1x256xf32> to vector<1x256xf32>
    %29 = vector.broadcast %28 : vector<1x256xf32> to vector<4x256xf32>
    %30 = arith.mulf %26, %29 : vector<4x256xf32>
    %c1_23 = arith.constant 1 : index
    %c0_24 = arith.constant 0 : index
    %c0_25 = arith.constant 0 : index
    %31 = vector.load %arg5[%c1_23, %c0_24, %c0_25] : memref<9x8x4xf32, #tpu.memory_space<vmem>>, vector<1x8x4xf32>
    %32 = vector.shape_cast %31 : vector<1x8x4xf32> to vector<8x4xf32>
    %cst_26 = arith.constant dense<0.000000e+00> : vector<8x256xf32>
    %33 = tpu.matmul %32, %30, %cst_26 {dimension_numbers = #tpu.dot_dimension_numbers<[1], [0], [0], [1], [0, 0, 1, 1], [], []>} : vector<8x4xf32>, vector<4x256xf32>, vector<8x256xf32> -> vector<8x256xf32>
    %34 = arith.addf %25, %33 : vector<8x256xf32>
    %c0_27 = arith.constant 0 : index
    %c113 = arith.constant 113 : index
    %35 = vector.load %arg14[%c0_27, %c113] : memref<4x512xf32, #tpu.memory_space<vmem>>, vector<4x256xf32>
    %c2 = arith.constant 2 : index
    %c0_28 = arith.constant 0 : index
    %c0_29 = arith.constant 0 : index
    %36 = vector.load %arg2[%c2, %c0_28, %c0_29] : memref<3x1x256xf32, #tpu.memory_space<vmem>>, vector<1x1x256xf32>
    %37 = vector.shape_cast %36 : vector<1x1x256xf32> to vector<1x256xf32>
    %38 = vector.broadcast %37 : vector<1x256xf32> to vector<4x256xf32>
    %39 = arith.mulf %35, %38 : vector<4x256xf32>
    %c2_30 = arith.constant 2 : index
    %c0_31 = arith.constant 0 : index
    %c0_32 = arith.constant 0 : index
    %40 = vector.load %arg5[%c2_30, %c0_31, %c0_32] : memref<9x8x4xf32, #tpu.memory_space<vmem>>, vector<1x8x4xf32>
    %41 = vector.shape_cast %40 : vector<1x8x4xf32> to vector<8x4xf32>
    %cst_33 = arith.constant dense<0.000000e+00> : vector<8x256xf32>
    %42 = tpu.matmul %41, %39, %cst_33 {dimension_numbers = #tpu.dot_dimension_numbers<[1], [0], [0], [1], [0, 0, 1, 1], [], []>} : vector<8x4xf32>, vector<4x256xf32>, vector<8x256xf32> -> vector<8x256xf32>
    %43 = arith.addf %34, %42 : vector<8x256xf32>
    %c0_34 = arith.constant 0 : index
    %c127 = arith.constant 127 : index
    %44 = vector.load %arg14[%c0_34, %c127] : memref<4x512xf32, #tpu.memory_space<vmem>>, vector<4x256xf32>
    %c0_35 = arith.constant 0 : index
    %c0_36 = arith.constant 0 : index
    %c0_37 = arith.constant 0 : index
    %45 = vector.load %arg2[%c0_35, %c0_36, %c0_37] : memref<3x1x256xf32, #tpu.memory_space<vmem>>, vector<1x1x256xf32>
    %46 = vector.shape_cast %45 : vector<1x1x256xf32> to vector<1x256xf32>
    %47 = vector.broadcast %46 : vector<1x256xf32> to vector<4x256xf32>
    %48 = arith.mulf %44, %47 : vector<4x256xf32>
    %c3 = arith.constant 3 : index
    %c0_38 = arith.constant 0 : index
    %c0_39 = arith.constant 0 : index
    %49 = vector.load %arg5[%c3, %c0_38, %c0_39] : memref<9x8x4xf32, #tpu.memory_space<vmem>>, vector<1x8x4xf32>
    %50 = vector.shape_cast %49 : vector<1x8x4xf32> to vector<8x4xf32>
    %cst_40 = arith.constant dense<0.000000e+00> : vector<8x256xf32>
    %51 = tpu.matmul %50, %48, %cst_40 {dimension_numbers = #tpu.dot_dimension_numbers<[1], [0], [0], [1], [0, 0, 1, 1], [], []>} : vector<8x4xf32>, vector<4x256xf32>, vector<8x256xf32> -> vector<8x256xf32>
    %52 = arith.addf %43, %51 : vector<8x256xf32>
    %c0_41 = arith.constant 0 : index
    %c128_42 = arith.constant 128 : index
    %53 = vector.load %arg14[%c0_41, %c128_42] : memref<4x512xf32, #tpu.memory_space<vmem>>, vector<4x256xf32>
    %c1_43 = arith.constant 1 : index
    %c0_44 = arith.constant 0 : index
    %c0_45 = arith.constant 0 : index
    %54 = vector.load %arg2[%c1_43, %c0_44, %c0_45] : memref<3x1x256xf32, #tpu.memory_space<vmem>>, vector<1x1x256xf32>
    %55 = vector.shape_cast %54 : vector<1x1x256xf32> to vector<1x256xf32>
    %56 = vector.broadcast %55 : vector<1x256xf32> to vector<4x256xf32>
    %57 = arith.mulf %53, %56 : vector<4x256xf32>
    %c4 = arith.constant 4 : index
    %c0_46 = arith.constant 0 : index
    %c0_47 = arith.constant 0 : index
    %58 = vector.load %arg5[%c4, %c0_46, %c0_47] : memref<9x8x4xf32, #tpu.memory_space<vmem>>, vector<1x8x4xf32>
    %59 = vector.shape_cast %58 : vector<1x8x4xf32> to vector<8x4xf32>
    %cst_48 = arith.constant dense<0.000000e+00> : vector<8x256xf32>
    %60 = tpu.matmul %59, %57, %cst_48 {dimension_numbers = #tpu.dot_dimension_numbers<[1], [0], [0], [1], [0, 0, 1, 1], [], []>} : vector<8x4xf32>, vector<4x256xf32>, vector<8x256xf32> -> vector<8x256xf32>
    %61 = arith.addf %52, %60 : vector<8x256xf32>
    %c0_49 = arith.constant 0 : index
    %c129 = arith.constant 129 : index
    %62 = vector.load %arg14[%c0_49, %c129] : memref<4x512xf32, #tpu.memory_space<vmem>>, vector<4x256xf32>
    %c2_50 = arith.constant 2 : index
    %c0_51 = arith.constant 0 : index
    %c0_52 = arith.constant 0 : index
    %63 = vector.load %arg2[%c2_50, %c0_51, %c0_52] : memref<3x1x256xf32, #tpu.memory_space<vmem>>, vector<1x1x256xf32>
    %64 = vector.shape_cast %63 : vector<1x1x256xf32> to vector<1x256xf32>
    %65 = vector.broadcast %64 : vector<1x256xf32> to vector<4x256xf32>
    %66 = arith.mulf %62, %65 : vector<4x256xf32>
    %c5 = arith.constant 5 : index
    %c0_53 = arith.constant 0 : index
    %c0_54 = arith.constant 0 : index
    %67 = vector.load %arg5[%c5, %c0_53, %c0_54] : memref<9x8x4xf32, #tpu.memory_space<vmem>>, vector<1x8x4xf32>
    %68 = vector.shape_cast %67 : vector<1x8x4xf32> to vector<8x4xf32>
    %cst_55 = arith.constant dense<0.000000e+00> : vector<8x256xf32>
    %69 = tpu.matmul %68, %66, %cst_55 {dimension_numbers = #tpu.dot_dimension_numbers<[1], [0], [0], [1], [0, 0, 1, 1], [], []>} : vector<8x4xf32>, vector<4x256xf32>, vector<8x256xf32> -> vector<8x256xf32>
    %70 = arith.addf %61, %69 : vector<8x256xf32>
    %c0_56 = arith.constant 0 : index
    %c143 = arith.constant 143 : index
    %71 = vector.load %arg14[%c0_56, %c143] : memref<4x512xf32, #tpu.memory_space<vmem>>, vector<4x256xf32>
    %c0_57 = arith.constant 0 : index
    %c0_58 = arith.constant 0 : index
    %c0_59 = arith.constant 0 : index
    %72 = vector.load %arg2[%c0_57, %c0_58, %c0_59] : memref<3x1x256xf32, #tpu.memory_space<vmem>>, vector<1x1x256xf32>
    %73 = vector.shape_cast %72 : vector<1x1x256xf32> to vector<1x256xf32>
    %74 = vector.broadcast %73 : vector<1x256xf32> to vector<4x256xf32>
    %75 = arith.mulf %71, %74 : vector<4x256xf32>
    %c6 = arith.constant 6 : index
    %c0_60 = arith.constant 0 : index
    %c0_61 = arith.constant 0 : index
    %76 = vector.load %arg5[%c6, %c0_60, %c0_61] : memref<9x8x4xf32, #tpu.memory_space<vmem>>, vector<1x8x4xf32>
    %77 = vector.shape_cast %76 : vector<1x8x4xf32> to vector<8x4xf32>
    %cst_62 = arith.constant dense<0.000000e+00> : vector<8x256xf32>
    %78 = tpu.matmul %77, %75, %cst_62 {dimension_numbers = #tpu.dot_dimension_numbers<[1], [0], [0], [1], [0, 0, 1, 1], [], []>} : vector<8x4xf32>, vector<4x256xf32>, vector<8x256xf32> -> vector<8x256xf32>
    %79 = arith.addf %70, %78 : vector<8x256xf32>
    %c0_63 = arith.constant 0 : index
    %c144 = arith.constant 144 : index
    %80 = vector.load %arg14[%c0_63, %c144] : memref<4x512xf32, #tpu.memory_space<vmem>>, vector<4x256xf32>
    %c1_64 = arith.constant 1 : index
    %c0_65 = arith.constant 0 : index
    %c0_66 = arith.constant 0 : index
    %81 = vector.load %arg2[%c1_64, %c0_65, %c0_66] : memref<3x1x256xf32, #tpu.memory_space<vmem>>, vector<1x1x256xf32>
    %82 = vector.shape_cast %81 : vector<1x1x256xf32> to vector<1x256xf32>
    %83 = vector.broadcast %82 : vector<1x256xf32> to vector<4x256xf32>
    %84 = arith.mulf %80, %83 : vector<4x256xf32>
    %c7 = arith.constant 7 : index
    %c0_67 = arith.constant 0 : index
    %c0_68 = arith.constant 0 : index
    %85 = vector.load %arg5[%c7, %c0_67, %c0_68] : memref<9x8x4xf32, #tpu.memory_space<vmem>>, vector<1x8x4xf32>
    %86 = vector.shape_cast %85 : vector<1x8x4xf32> to vector<8x4xf32>
    %cst_69 = arith.constant dense<0.000000e+00> : vector<8x256xf32>
    %87 = tpu.matmul %86, %84, %cst_69 {dimension_numbers = #tpu.dot_dimension_numbers<[1], [0], [0], [1], [0, 0, 1, 1], [], []>} : vector<8x4xf32>, vector<4x256xf32>, vector<8x256xf32> -> vector<8x256xf32>
    %88 = arith.addf %79, %87 : vector<8x256xf32>
    %c0_70 = arith.constant 0 : index
    %c145 = arith.constant 145 : index
    %89 = vector.load %arg14[%c0_70, %c145] : memref<4x512xf32, #tpu.memory_space<vmem>>, vector<4x256xf32>
    %c2_71 = arith.constant 2 : index
    %c0_72 = arith.constant 0 : index
    %c0_73 = arith.constant 0 : index
    %90 = vector.load %arg2[%c2_71, %c0_72, %c0_73] : memref<3x1x256xf32, #tpu.memory_space<vmem>>, vector<1x1x256xf32>
    %91 = vector.shape_cast %90 : vector<1x1x256xf32> to vector<1x256xf32>
    %92 = vector.broadcast %91 : vector<1x256xf32> to vector<4x256xf32>
    %93 = arith.mulf %89, %92 : vector<4x256xf32>
    %c8 = arith.constant 8 : index
    %c0_74 = arith.constant 0 : index
    %c0_75 = arith.constant 0 : index
    %94 = vector.load %arg5[%c8, %c0_74, %c0_75] : memref<9x8x4xf32, #tpu.memory_space<vmem>>, vector<1x8x4xf32>
    %95 = vector.shape_cast %94 : vector<1x8x4xf32> to vector<8x4xf32>
    %cst_76 = arith.constant dense<0.000000e+00> : vector<8x256xf32>
    %96 = tpu.matmul %95, %93, %cst_76 {dimension_numbers = #tpu.dot_dimension_numbers<[1], [0], [0], [1], [0, 0, 1, 1], [], []>} : vector<8x4xf32>, vector<4x256xf32>, vector<8x256xf32> -> vector<8x256xf32>
    %97 = arith.addf %88, %96 : vector<8x256xf32>
    %c0_77 = arith.constant 0 : index
    %c0_78 = arith.constant 0 : index
    %98 = vector.load %arg6[%c0_77, %c0_78] : memref<8x1xf32, #tpu.memory_space<vmem>>, vector<8x1xf32>
    %99 = vector.broadcast %98 : vector<8x1xf32> to vector<8x256xf32>
    %100 = arith.addf %97, %99 : vector<8x256xf32>
    %c0_79 = arith.constant 0 : index
    %c0_80 = arith.constant 0 : index
    %101 = vector.load %arg7[%c0_79, %c0_80] : memref<8x1xf32, #tpu.memory_space<vmem>>, vector<8x1xf32>
    %102 = vector.broadcast %101 : vector<8x1xf32> to vector<8x256xf32>
    %103 = arith.mulf %100, %102 : vector<8x256xf32>
    %c0_81 = arith.constant 0 : index
    %c0_82 = arith.constant 0 : index
    %104 = vector.load %arg8[%c0_81, %c0_82] : memref<8x1xf32, #tpu.memory_space<vmem>>, vector<8x1xf32>
    %105 = vector.broadcast %104 : vector<8x1xf32> to vector<8x256xf32>
    %106 = arith.addf %103, %105 : vector<8x256xf32>
    %cst_83 = arith.constant 0.000000e+00 : f32
    %107 = vector.broadcast %cst_83 : f32 to vector<8x256xf32>
    %108 = arith.cmpf oge, %106, %107 : vector<8x256xf32>
    %cst_84 = arith.constant 0.00999999977 : f32
    %109 = vector.broadcast %cst_84 : f32 to vector<8x256xf32>
    %110 = arith.mulf %109, %106 : vector<8x256xf32>
    %111 = arith.select %108, %106, %110 : vector<8x256xi1>, vector<8x256xf32>
    %cst_85 = arith.constant 0.000000e+00 : f32
    %112 = vector.broadcast %cst_85 : f32 to vector<8x512xf32>
    %c0_86 = arith.constant 0 : index
    %c0_87 = arith.constant 0 : index
    %113 = vector.load %arg15[%c0_86, %c0_87] : memref<8x512xf32, #tpu.memory_space<vmem>>, vector<8x512xf32>
    tpu.vector_store %arg15[%c0_86, %c0_87], %112 {strides = array<i32>} : memref<8x512xf32, #tpu.memory_space<vmem>>, vector<8x512xf32>,
    %c0_88 = arith.constant 0 : index
    %c128_89 = arith.constant 128 : index
    %114 = vector.load %arg15[%c0_88, %c128_89] : memref<8x512xf32, #tpu.memory_space<vmem>>, vector<8x256xf32>
    tpu.vector_store %arg15[%c0_88, %c128_89], %111 {strides = array<i32>} : memref<8x512xf32, #tpu.memory_space<vmem>>, vector<8x256xf32>,
    %cst_90 = arith.constant 0.000000e+00 : f32
    %115 = vector.broadcast %cst_90 : f32 to vector<8x256xf32>
    %c0_91 = arith.constant 0 : index
    %c111_92 = arith.constant 111 : index
    %116 = vector.load %arg15[%c0_91, %c111_92] : memref<8x512xf32, #tpu.memory_space<vmem>>, vector<8x256xf32>
    %c0_93 = arith.constant 0 : index
    %c0_94 = arith.constant 0 : index
    %c0_95 = arith.constant 0 : index
    %117 = vector.load %arg2[%c0_93, %c0_94, %c0_95] : memref<3x1x256xf32, #tpu.memory_space<vmem>>, vector<1x1x256xf32>
    %118 = vector.shape_cast %117 : vector<1x1x256xf32> to vector<1x256xf32>
    %119 = vector.broadcast %118 : vector<1x256xf32> to vector<8x256xf32>
    %120 = arith.mulf %116, %119 : vector<8x256xf32>
    %c0_96 = arith.constant 0 : index
    %c0_97 = arith.constant 0 : index
    %c0_98 = arith.constant 0 : index
    %121 = vector.load %arg9[%c0_96, %c0_97, %c0_98] : memref<9x8x8xf32, #tpu.memory_space<vmem>>, vector<1x8x8xf32>
    %122 = vector.shape_cast %121 : vector<1x8x8xf32> to vector<8x8xf32>
    %cst_99 = arith.constant dense<0.000000e+00> : vector<8x256xf32>
    %123 = tpu.matmul %122, %120, %cst_99 {dimension_numbers = #tpu.dot_dimension_numbers<[1], [0], [0], [1], [0, 0, 1, 1], [], []>} : vector<8x8xf32>, vector<8x256xf32>, vector<8x256xf32> -> vector<8x256xf32>
    %124 = arith.addf %115, %123 : vector<8x256xf32>
    %c0_100 = arith.constant 0 : index
    %c112_101 = arith.constant 112 : index
    %125 = vector.load %arg15[%c0_100, %c112_101] : memref<8x512xf32, #tpu.memory_space<vmem>>, vector<8x256xf32>
    %c1_102 = arith.constant 1 : index
    %c0_103 = arith.constant 0 : index
    %c0_104 = arith.constant 0 : index
    %126 = vector.load %arg2[%c1_102, %c0_103, %c0_104] : memref<3x1x256xf32, #tpu.memory_space<vmem>>, vector<1x1x256xf32>
    %127 = vector.shape_cast %126 : vector<1x1x256xf32> to vector<1x256xf32>
    %128 = vector.broadcast %127 : vector<1x256xf32> to vector<8x256xf32>
    %129 = arith.mulf %125, %128 : vector<8x256xf32>
    %c1_105 = arith.constant 1 : index
    %c0_106 = arith.constant 0 : index
    %c0_107 = arith.constant 0 : index
    %130 = vector.load %arg9[%c1_105, %c0_106, %c0_107] : memref<9x8x8xf32, #tpu.memory_space<vmem>>, vector<1x8x8xf32>
    %131 = vector.shape_cast %130 : vector<1x8x8xf32> to vector<8x8xf32>
    %cst_108 = arith.constant dense<0.000000e+00> : vector<8x256xf32>
    %132 = tpu.matmul %131, %129, %cst_108 {dimension_numbers = #tpu.dot_dimension_numbers<[1], [0], [0], [1], [0, 0, 1, 1], [], []>} : vector<8x8xf32>, vector<8x256xf32>, vector<8x256xf32> -> vector<8x256xf32>
    %133 = arith.addf %124, %132 : vector<8x256xf32>
    %c0_109 = arith.constant 0 : index
    %c113_110 = arith.constant 113 : index
    %134 = vector.load %arg15[%c0_109, %c113_110] : memref<8x512xf32, #tpu.memory_space<vmem>>, vector<8x256xf32>
    %c2_111 = arith.constant 2 : index
    %c0_112 = arith.constant 0 : index
    %c0_113 = arith.constant 0 : index
    %135 = vector.load %arg2[%c2_111, %c0_112, %c0_113] : memref<3x1x256xf32, #tpu.memory_space<vmem>>, vector<1x1x256xf32>
    %136 = vector.shape_cast %135 : vector<1x1x256xf32> to vector<1x256xf32>
    %137 = vector.broadcast %136 : vector<1x256xf32> to vector<8x256xf32>
    %138 = arith.mulf %134, %137 : vector<8x256xf32>
    %c2_114 = arith.constant 2 : index
    %c0_115 = arith.constant 0 : index
    %c0_116 = arith.constant 0 : index
    %139 = vector.load %arg9[%c2_114, %c0_115, %c0_116] : memref<9x8x8xf32, #tpu.memory_space<vmem>>, vector<1x8x8xf32>
    %140 = vector.shape_cast %139 : vector<1x8x8xf32> to vector<8x8xf32>
    %cst_117 = arith.constant dense<0.000000e+00> : vector<8x256xf32>
    %141 = tpu.matmul %140, %138, %cst_117 {dimension_numbers = #tpu.dot_dimension_numbers<[1], [0], [0], [1], [0, 0, 1, 1], [], []>} : vector<8x8xf32>, vector<8x256xf32>, vector<8x256xf32> -> vector<8x256xf32>
    %142 = arith.addf %133, %141 : vector<8x256xf32>
    %c0_118 = arith.constant 0 : index
    %c127_119 = arith.constant 127 : index
    %143 = vector.load %arg15[%c0_118, %c127_119] : memref<8x512xf32, #tpu.memory_space<vmem>>, vector<8x256xf32>
    %c0_120 = arith.constant 0 : index
    %c0_121 = arith.constant 0 : index
    %c0_122 = arith.constant 0 : index
    %144 = vector.load %arg2[%c0_120, %c0_121, %c0_122] : memref<3x1x256xf32, #tpu.memory_space<vmem>>, vector<1x1x256xf32>
    %145 = vector.shape_cast %144 : vector<1x1x256xf32> to vector<1x256xf32>
    %146 = vector.broadcast %145 : vector<1x256xf32> to vector<8x256xf32>
    %147 = arith.mulf %143, %146 : vector<8x256xf32>
    %c3_123 = arith.constant 3 : index
    %c0_124 = arith.constant 0 : index
    %c0_125 = arith.constant 0 : index
    %148 = vector.load %arg9[%c3_123, %c0_124, %c0_125] : memref<9x8x8xf32, #tpu.memory_space<vmem>>, vector<1x8x8xf32>
    %149 = vector.shape_cast %148 : vector<1x8x8xf32> to vector<8x8xf32>
    %cst_126 = arith.constant dense<0.000000e+00> : vector<8x256xf32>
    %150 = tpu.matmul %149, %147, %cst_126 {dimension_numbers = #tpu.dot_dimension_numbers<[1], [0], [0], [1], [0, 0, 1, 1], [], []>} : vector<8x8xf32>, vector<8x256xf32>, vector<8x256xf32> -> vector<8x256xf32>
    %151 = arith.addf %142, %150 : vector<8x256xf32>
    %c0_127 = arith.constant 0 : index
    %c128_128 = arith.constant 128 : index
    %152 = vector.load %arg15[%c0_127, %c128_128] : memref<8x512xf32, #tpu.memory_space<vmem>>, vector<8x256xf32>
    %c1_129 = arith.constant 1 : index
    %c0_130 = arith.constant 0 : index
    %c0_131 = arith.constant 0 : index
    %153 = vector.load %arg2[%c1_129, %c0_130, %c0_131] : memref<3x1x256xf32, #tpu.memory_space<vmem>>, vector<1x1x256xf32>
    %154 = vector.shape_cast %153 : vector<1x1x256xf32> to vector<1x256xf32>
    %155 = vector.broadcast %154 : vector<1x256xf32> to vector<8x256xf32>
    %156 = arith.mulf %152, %155 : vector<8x256xf32>
    %c4_132 = arith.constant 4 : index
    %c0_133 = arith.constant 0 : index
    %c0_134 = arith.constant 0 : index
    %157 = vector.load %arg9[%c4_132, %c0_133, %c0_134] : memref<9x8x8xf32, #tpu.memory_space<vmem>>, vector<1x8x8xf32>
    %158 = vector.shape_cast %157 : vector<1x8x8xf32> to vector<8x8xf32>
    %cst_135 = arith.constant dense<0.000000e+00> : vector<8x256xf32>
    %159 = tpu.matmul %158, %156, %cst_135 {dimension_numbers = #tpu.dot_dimension_numbers<[1], [0], [0], [1], [0, 0, 1, 1], [], []>} : vector<8x8xf32>, vector<8x256xf32>, vector<8x256xf32> -> vector<8x256xf32>
    %160 = arith.addf %151, %159 : vector<8x256xf32>
    %c0_136 = arith.constant 0 : index
    %c129_137 = arith.constant 129 : index
    %161 = vector.load %arg15[%c0_136, %c129_137] : memref<8x512xf32, #tpu.memory_space<vmem>>, vector<8x256xf32>
    %c2_138 = arith.constant 2 : index
    %c0_139 = arith.constant 0 : index
    %c0_140 = arith.constant 0 : index
    %162 = vector.load %arg2[%c2_138, %c0_139, %c0_140] : memref<3x1x256xf32, #tpu.memory_space<vmem>>, vector<1x1x256xf32>
    %163 = vector.shape_cast %162 : vector<1x1x256xf32> to vector<1x256xf32>
    %164 = vector.broadcast %163 : vector<1x256xf32> to vector<8x256xf32>
    %165 = arith.mulf %161, %164 : vector<8x256xf32>
    %c5_141 = arith.constant 5 : index
    %c0_142 = arith.constant 0 : index
    %c0_143 = arith.constant 0 : index
    %166 = vector.load %arg9[%c5_141, %c0_142, %c0_143] : memref<9x8x8xf32, #tpu.memory_space<vmem>>, vector<1x8x8xf32>
    %167 = vector.shape_cast %166 : vector<1x8x8xf32> to vector<8x8xf32>
    %cst_144 = arith.constant dense<0.000000e+00> : vector<8x256xf32>
    %168 = tpu.matmul %167, %165, %cst_144 {dimension_numbers = #tpu.dot_dimension_numbers<[1], [0], [0], [1], [0, 0, 1, 1], [], []>} : vector<8x8xf32>, vector<8x256xf32>, vector<8x256xf32> -> vector<8x256xf32>
    %169 = arith.addf %160, %168 : vector<8x256xf32>
    %c0_145 = arith.constant 0 : index
    %c143_146 = arith.constant 143 : index
    %170 = vector.load %arg15[%c0_145, %c143_146] : memref<8x512xf32, #tpu.memory_space<vmem>>, vector<8x256xf32>
    %c0_147 = arith.constant 0 : index
    %c0_148 = arith.constant 0 : index
    %c0_149 = arith.constant 0 : index
    %171 = vector.load %arg2[%c0_147, %c0_148, %c0_149] : memref<3x1x256xf32, #tpu.memory_space<vmem>>, vector<1x1x256xf32>
    %172 = vector.shape_cast %171 : vector<1x1x256xf32> to vector<1x256xf32>
    %173 = vector.broadcast %172 : vector<1x256xf32> to vector<8x256xf32>
    %174 = arith.mulf %170, %173 : vector<8x256xf32>
    %c6_150 = arith.constant 6 : index
    %c0_151 = arith.constant 0 : index
    %c0_152 = arith.constant 0 : index
    %175 = vector.load %arg9[%c6_150, %c0_151, %c0_152] : memref<9x8x8xf32, #tpu.memory_space<vmem>>, vector<1x8x8xf32>
    %176 = vector.shape_cast %175 : vector<1x8x8xf32> to vector<8x8xf32>
    %cst_153 = arith.constant dense<0.000000e+00> : vector<8x256xf32>
    %177 = tpu.matmul %176, %174, %cst_153 {dimension_numbers = #tpu.dot_dimension_numbers<[1], [0], [0], [1], [0, 0, 1, 1], [], []>} : vector<8x8xf32>, vector<8x256xf32>, vector<8x256xf32> -> vector<8x256xf32>
    %178 = arith.addf %169, %177 : vector<8x256xf32>
    %c0_154 = arith.constant 0 : index
    %c144_155 = arith.constant 144 : index
    %179 = vector.load %arg15[%c0_154, %c144_155] : memref<8x512xf32, #tpu.memory_space<vmem>>, vector<8x256xf32>
    %c1_156 = arith.constant 1 : index
    %c0_157 = arith.constant 0 : index
    %c0_158 = arith.constant 0 : index
    %180 = vector.load %arg2[%c1_156, %c0_157, %c0_158] : memref<3x1x256xf32, #tpu.memory_space<vmem>>, vector<1x1x256xf32>
    %181 = vector.shape_cast %180 : vector<1x1x256xf32> to vector<1x256xf32>
    %182 = vector.broadcast %181 : vector<1x256xf32> to vector<8x256xf32>
    %183 = arith.mulf %179, %182 : vector<8x256xf32>
    %c7_159 = arith.constant 7 : index
    %c0_160 = arith.constant 0 : index
    %c0_161 = arith.constant 0 : index
    %184 = vector.load %arg9[%c7_159, %c0_160, %c0_161] : memref<9x8x8xf32, #tpu.memory_space<vmem>>, vector<1x8x8xf32>
    %185 = vector.shape_cast %184 : vector<1x8x8xf32> to vector<8x8xf32>
    %cst_162 = arith.constant dense<0.000000e+00> : vector<8x256xf32>
    %186 = tpu.matmul %185, %183, %cst_162 {dimension_numbers = #tpu.dot_dimension_numbers<[1], [0], [0], [1], [0, 0, 1, 1], [], []>} : vector<8x8xf32>, vector<8x256xf32>, vector<8x256xf32> -> vector<8x256xf32>
    %187 = arith.addf %178, %186 : vector<8x256xf32>
    %c0_163 = arith.constant 0 : index
    %c145_164 = arith.constant 145 : index
    %188 = vector.load %arg15[%c0_163, %c145_164] : memref<8x512xf32, #tpu.memory_space<vmem>>, vector<8x256xf32>
    %c2_165 = arith.constant 2 : index
    %c0_166 = arith.constant 0 : index
    %c0_167 = arith.constant 0 : index
    %189 = vector.load %arg2[%c2_165, %c0_166, %c0_167] : memref<3x1x256xf32, #tpu.memory_space<vmem>>, vector<1x1x256xf32>
    %190 = vector.shape_cast %189 : vector<1x1x256xf32> to vector<1x256xf32>
    %191 = vector.broadcast %190 : vector<1x256xf32> to vector<8x256xf32>
    %192 = arith.mulf %188, %191 : vector<8x256xf32>
    %c8_168 = arith.constant 8 : index
    %c0_169 = arith.constant 0 : index
    %c0_170 = arith.constant 0 : index
    %193 = vector.load %arg9[%c8_168, %c0_169, %c0_170] : memref<9x8x8xf32, #tpu.memory_space<vmem>>, vector<1x8x8xf32>
    %194 = vector.shape_cast %193 : vector<1x8x8xf32> to vector<8x8xf32>
    %cst_171 = arith.constant dense<0.000000e+00> : vector<8x256xf32>
    %195 = tpu.matmul %194, %192, %cst_171 {dimension_numbers = #tpu.dot_dimension_numbers<[1], [0], [0], [1], [0, 0, 1, 1], [], []>} : vector<8x8xf32>, vector<8x256xf32>, vector<8x256xf32> -> vector<8x256xf32>
    %196 = arith.addf %187, %195 : vector<8x256xf32>
    %c0_172 = arith.constant 0 : index
    %c0_173 = arith.constant 0 : index
    %197 = vector.load %arg10[%c0_172, %c0_173] : memref<8x1xf32, #tpu.memory_space<vmem>>, vector<8x1xf32>
    %198 = vector.broadcast %197 : vector<8x1xf32> to vector<8x256xf32>
    %199 = arith.addf %196, %198 : vector<8x256xf32>
    %c0_174 = arith.constant 0 : index
    %c0_175 = arith.constant 0 : index
    %200 = vector.load %arg11[%c0_174, %c0_175] : memref<8x4xf32, #tpu.memory_space<vmem>>, vector<8x4xf32>
    %cst_176 = arith.constant dense<0.000000e+00> : vector<8x256xf32>
    %201 = tpu.matmul %200, %1, %cst_176 {dimension_numbers = #tpu.dot_dimension_numbers<[1], [0], [0], [1], [0, 0, 1, 1], [], []>} : vector<8x4xf32>, vector<4x256xf32>, vector<8x256xf32> -> vector<8x256xf32>
    %c0_177 = arith.constant 0 : index
    %c0_178 = arith.constant 0 : index
    %202 = vector.load %arg12[%c0_177, %c0_178] : memref<8x1xf32, #tpu.memory_space<vmem>>, vector<8x1xf32>
    %203 = vector.broadcast %202 : vector<8x1xf32> to vector<8x256xf32>
    %204 = arith.addf %201, %203 : vector<8x256xf32>
    %205 = arith.addf %199, %204 : vector<8x256xf32>
    %c0_179 = arith.constant 0 : index
    %c0_180 = arith.constant 0 : index
    %c0_181 = arith.constant 0 : index
    %206 = vector.load %arg13[%c0_179, %c0_180, %c0_181] : memref<1x8x256xf32, #tpu.memory_space<vmem>>, vector<1x8x256xf32>
    %207 = vector.shape_cast %206 : vector<1x8x256xf32> to vector<8x256xf32>
    %208 = vector.shape_cast %205 : vector<8x256xf32> to vector<1x8x256xf32>
    tpu.vector_store %arg13[%c0_179, %c0_180, %c0_181], %208 {strides = array<i32>} : memref<1x8x256xf32, #tpu.memory_space<vmem>>, vector<1x8x256xf32>,
    return
  }
  func.func @transform_0(%arg0: i32) -> (i32, i32, i32) {
    %c0_i32 = arith.constant 0 : i32
    %c0_i32_0 = arith.constant 0 : i32
    %c0_i32_1 = arith.constant 0 : i32
    return %arg0, %c0_i32, %c0_i32_0 : i32, i32, i32
  }
  func.func @transform_1(%arg0: i32) -> (i32, i32, i32) {
    %c0_i32 = arith.constant 0 : i32
    %c0_i32_0 = arith.constant 0 : i32
    %c0_i32_1 = arith.constant 0 : i32
    %c0_i32_2 = arith.constant 0 : i32
    return %c0_i32, %c0_i32_0, %c0_i32_1 : i32, i32, i32
  }
  func.func @transform_2(%arg0: i32) -> (i32, i32) {
    %c0_i32 = arith.constant 0 : i32
    %c0_i32_0 = arith.constant 0 : i32
    %c0_i32_1 = arith.constant 0 : i32
    return %c0_i32, %c0_i32_0 : i32, i32
  }
  func.func @transform_3(%arg0: i32) -> (i32, i32) {
    %c0_i32 = arith.constant 0 : i32
    %c0_i32_0 = arith.constant 0 : i32
    %c0_i32_1 = arith.constant 0 : i32
    return %c0_i32, %c0_i32_0 : i32, i32
  }
  func.func @transform_4(%arg0: i32) -> (i32, i32, i32) {
    %c0_i32 = arith.constant 0 : i32
    %c0_i32_0 = arith.constant 0 : i32
    %c0_i32_1 = arith.constant 0 : i32
    %c0_i32_2 = arith.constant 0 : i32
    return %c0_i32, %c0_i32_0, %c0_i32_1 : i32, i32, i32
  }
  func.func @transform_5(%arg0: i32) -> (i32, i32) {
    %c0_i32 = arith.constant 0 : i32
    %c0_i32_0 = arith.constant 0 : i32
    %c0_i32_1 = arith.constant 0 : i32
    return %c0_i32, %c0_i32_0 : i32, i32
  }
  func.func @transform_6(%arg0: i32) -> (i32, i32) {
    %c0_i32 = arith.constant 0 : i32
    %c0_i32_0 = arith.constant 0 : i32
    %c0_i32_1 = arith.constant 0 : i32
    return %c0_i32, %c0_i32_0 : i32, i32
  }
  func.func @transform_7(%arg0: i32) -> (i32, i32) {
    %c0_i32 = arith.constant 0 : i32
    %c0_i32_0 = arith.constant 0 : i32
    %c0_i32_1 = arith.constant 0 : i32
    return %c0_i32, %c0_i32_0 : i32, i32
  }
  func.func @transform_8(%arg0: i32) -> (i32, i32, i32) {
    %c0_i32 = arith.constant 0 : i32
    %c0_i32_0 = arith.constant 0 : i32
    %c0_i32_1 = arith.constant 0 : i32
    %c0_i32_2 = arith.constant 0 : i32
    return %c0_i32, %c0_i32_0, %c0_i32_1 : i32, i32, i32
  }
  func.func @transform_9(%arg0: i32) -> (i32, i32) {
    %c0_i32 = arith.constant 0 : i32
    %c0_i32_0 = arith.constant 0 : i32
    %c0_i32_1 = arith.constant 0 : i32
    return %c0_i32, %c0_i32_0 : i32, i32
  }
  func.func @transform_10(%arg0: i32) -> (i32, i32) {
    %c0_i32 = arith.constant 0 : i32
    %c0_i32_0 = arith.constant 0 : i32
    %c0_i32_1 = arith.constant 0 : i32
    return %c0_i32, %c0_i32_0 : i32, i32
  }
  func.func @transform_11(%arg0: i32) -> (i32, i32) {
    %c0_i32 = arith.constant 0 : i32
    %c0_i32_0 = arith.constant 0 : i32
    %c0_i32_1 = arith.constant 0 : i32
    return %c0_i32, %c0_i32_0 : i32, i32
  }
  func.func @transform_12(%arg0: i32) -> (i32, i32, i32) {
    %c0_i32 = arith.constant 0 : i32
    %c0_i32_0 = arith.constant 0 : i32
    %c0_i32_1 = arith.constant 0 : i32
    return %arg0, %c0_i32, %c0_i32_0 : i32, i32, i32
  }
}

</mosaic_0001>

<bundles_post_ra>
// kernel: tpu_custom_call.1
= control target key start
LH: loop header
LB: loop body
LE: loop exit
PB: predicated region body
PF: predicated region fallthrough
CT: control target
= control target key end

     0   :  { %s3273_s0 = inlined_call_operand.vmem [shape: f32[2,4,256], index: 0, kind: input, shape index: {}]   ;;  %s3274_s1 = inlined_call_operand.vmem [shape: f32[3,1,256], index: 1, kind: input, shape index: {}]   ;;  %s3275_s2 = inlined_call_operand.vmem [shape: f32[4,1], index: 2, kind: input, shape index: {}]   ;;  %s3276_s3 = inlined_call_operand.vmem [shape: f32[4,1], index: 3, kind: input, shape index: {}]   ;;  %s3277_s4 = inlined_call_operand.vmem [shape: f32[9,8,4], index: 4, kind: input, shape index: {}]   ;;  %s3278_s5 = inlined_call_operand.vmem [shape: f32[8,1], index: 5, kind: input, shape index: {}]   ;;  %s3279_s6 = inlined_call_operand.vmem [shape: f32[8,1], index: 6, kind: input, shape index: {}]   ;;  %s3280_s7 = inlined_call_operand.vmem [shape: f32[8,1], index: 7, kind: input, shape index: {}]   ;;  %s3281_s8 = inlined_call_operand.vmem [shape: f32[9,8,8], index: 8, kind: input, shape index: {}]   ;;  %s3282_s9 = inlined_call_operand.vmem [shape: f32[8,1], index: 9, kind: input, shape index: {}]   ;;  %s3283_s10 = inlined_call_operand.vmem [shape: f32[8,4], index: 10, kind: input, shape index: {}]   ;;  %s3284_s11 = inlined_call_operand.vmem [shape: f32[8,1], index: 11, kind: input, shape index: {}]   ;;  %s3285_s12 = inlined_call_operand.hbm [shape: f32[2,8,256], index: 12, kind: output, shape index: {}]  }
   0x1   :  { %3302 = sst [smem:[#allocation8_spill]] %s3273_s0 }
   0x2   :  { %3303 = sst [smem:[#allocation9_spill]] %s3275_s2 }
   0x3   :  { %3304 = sst [smem:[#allocation10_spill]] %s3276_s3 }
   0x4   :  { %17 = vsyncpa [#allocation5], 0 }
   0x5   :  { %19 = vsyncpa [#allocation5 + $0x1], 0  ;;  %s2800_s21 = smov 0   ;;  %s2802_s22 = smov 0  }
   0x6   :  { %s2804_s23 = smov 0   ;;  %s2806_s24 = smov 0  }
   0x7 LB: > { %s2821_s25 = sadd.s32 4294967295, %s2721_s24   ;;  %s2535_s26 = sadd.s32 4294967294, %s2721_s24   ;;  %s2721_s24 = sphi %s2806_s24, %s3323_s24   ;;  %s2717_s23 = sphi %s2804_s23, %s3322_s23   ;;  %s2713_s22 = sphi %s2802_s22, %s3321_s22   ;;  %s2709_s21 = sphi %s2800_s21, %s3320_s21  }
   0x8   : > { %s2825_s27 = sadd.s32 1, %s2721_s24   ;;  %s289_s28 = sadd.s32 1, %s2717_s23 }
   0x9   : > { %s286_s29 = ssub.s32 %s2721_s24, %s2825_s27  ;;  %p299_p0 = scmp.ne.s32.totalorder %s2717_s23, %s2713_s22 }
   0xa   : > { %p287_p1 = scmp.eq.s32.totalorder %s286_s29, 0  ;;  %p300_p2 = scmp.eq.s32.totalorder %s2821_s25, 1 }
   0xb   : > { %p305_p3 = scmp.ne.s32.totalorder %s2713_s22, %s2709_s21  ;;  %p306_p4 = scmp.eq.s32.totalorder %s2535_s26, 1 }
   0xc   : > { %s2836_s30 = scalar_select %p287_p1, %s2717_s23, %s289_s28  }
   0xd   : > { %p2838_p5 = por %p300_p2, %p299_p0  ;;  %p2842_p6 = por %p306_p4, %p305_p3 }
   0xe   : > { %3305 = sst [smem:[#allocation7_spill]] %s2836_s30  ;;  %p2538_p7 = scmp.ge.s32.totalorder %s2721_s24, 1 }
   0xf   : > { %p365_p8 = scmp.lt.s32.totalorder %s2721_s24, 3 }
  0x11   : > { %p366_p9 = pnand %p2538_p7, %p365_p8 }
  0x12   : > { %s3308_s2 = sld [smem:[#allocation9_spill]] (!%p366_p9)  ;;  %s3290_s16 = smov (!%p366_p9), 112  }
  0x13   : > { %369 = sbr.rel (%p366_p9) target bundleno = 899 (0x383), region = 68  ;;  %s3309_s3 = sld [smem:[#allocation10_spill]] (!%p366_p9) }
  0x14   : > { %s3300_s17 = smov (!%p366_p9), 113   ;;  %s3286_s18 = smov (!%p366_p9), 111  }
  0x15   : > { %s3288_s19 = smov (!%p366_p9), 1   ;;  %s3292_s20 = smov (!%p366_p9), 127  }
  0x16   : > { %s3296_s26 = smov (!%p366_p9), 16   ;;  %s3298_s28 = smov (!%p366_p9), 15  }
  0x17   : > { %s3294_s29 = smov (!%p366_p9), 17   ;;  %p407_p10 = scmp.lt.s32.totalorder (!%p366_p9), %s2821_s25, 1 }
  0x18   : > { %v413_v0 = vld [vmem:[%s3308_s2] sm:$0xf]  ;;  %v421_v1 = vlaneseq  ;;  %v2723_v2 = vmov 0   ;;  %v2550_v9 = vld [vmem:[%s3274_s1 + $0x4] sm:$0x3]  ;;  %v2724_v10 = vmov 0.0  }
  0x19   : > { %2658 = vset.pattern.permute.xlu0 %v2723_v2  ;;  %2659 = vset.pattern.permute.xlu1 %v2723_v2  ;;  %v427_v3 = vld [vmem:[%s3309_s3] sm:$0xf]  ;;  %444 = vst [vmem:[#allocation2] sm:$0xff] %v2724_v10  ;;  %445 = vst [vmem:[#allocation2 + $0x8] sm:$0xff] %v2724_v10  ;;  %v2733_v20 = vmov 839922192  }
  0x1a   : > { %416 = vperm.xlu0 %2658, %v413_v0   ;;  %v422_v4 = vshrl.u32 %v421_v1, 7  ;;  %v2542_v5 = vld [vmem:[%s3274_s1 + $0x2] sm:$0x3]  ;;  %v449_v6 = vld [vmem:[%s3274_s1] sm:$0x3]  ;;  %578 = vmatprep.mubr.f32.mxu0 %v2724_v10  ;;  %v419_v21 = vunpack.c.l.s4 %v2733_v20  ;;  %s408_s15 = scalar_select %p407_p10, %s2821_s25, 1 }
  0x1b   : > { %668 = vmatprep.mubr.f32.mxu1 %v2724_v10  ;;  %s3310_s0 = sld [smem:[#allocation8_spill]]  ;;  %vm485_vm1 = vcmask 916480   ;;  %vm463_vm2 = vcmask 908288   ;;  %vm692_vm3 = vcmask 924672   ;;  %vm797_vm4 = vcmask 1039360   ;;  %s3315_s2 = smov 113  }
  0x1c   : > { %v2860_v7 = vsub.s32 0, %v422_v4  ;;  %v2862_v8 = vsub.s32 1, %v422_v4  ;;  %v420_v22 = vunpack.c.0.s8 %v419_v21  ;;  %vm814_vm5 = vcmask 7168   ;;  %s3316_s3 = smov 15   ;;  %s3317_s30 = smov 16  }
  0x1d   : > { %vm709_vm6 = vcmask 121856   ;;  %vm502_vm7 = vcmask 130048   ;;  %vm594_vm8 = vcmask 138240   ;;  %vm509_vm9 = vcmask 1043456  }
  0x1e   : > { %430 = vperm.xlu0 %2658, %v427_v3   ;;  %v476_v11 = vrot.slane %v2542_v5, %v2860_v7  ;;  %v480_v12 = vrot.slane %v2542_v5, %v2862_v8  ;;  %v454_v13 = vrot.slane %v449_v6, %v2860_v7  ;;  %v458_v14 = vrot.slane %v449_v6, %v2862_v8 }
  0x1f   : > { %v683_v15 = vrot.slane %v2550_v9, %v2860_v7  ;;  %v687_v16 = vrot.slane %v2550_v9, %v2862_v8  ;;  %v423_v23 = vsub.s32 %v420_v22, %v422_v4  ;;  %vm505_vm10 = vcmask 31744  }
  0x20   : > { %v2877_v17 = vcombine.low %v476_v11, %v480_v12  ;;  %v459_v19 = vcombine.low %v454_v13, %v458_v14  ;;  %v1088_v37 = vld [vmem:[#allocation2 + $0xc] sm:$0xf]  ;;  %vm1495_vm13 = vcmask 64512  }
  0x21   : > { %v688_v18 = vcombine.low %v683_v15, %v687_v16  ;;  %v985_v40 = vld [vmem:[#allocation2 + $0xc] sm:$0xf] }
  0x22   : > { %482 = vrot.lane.b32.xlu1 %v2877_v17, %s3290_s16  ;;  %v1191_v46 = vld [vmem:[#allocation2 + $0xc] sm:$0xf]  ;;  %s3311_s16 = smov 127  }
  0x23   : > { %689 = vrot.lane.b32.xlu0 %v688_v18, %s3300_s17 }
  0x26   : > { %460 = vrot.lane.b32.xlu1 %v459_v19, %s3286_s18  ;;  %s2606_s18 = sshll.u32 %s408_s15, 3  ;;  %s404_s15 = sand.u32 1, %s2713_s22  }
  0x27   : > { %986 = vrot.lane.b32.xlu0 %v688_v18, %s3288_s19  ;;  %s3313_s19 = smov 1  }
  0x2a   : > { %794 = vrot.lane.b32.xlu1 %v459_v19, %s3292_s20  ;;  %s411_s20 = scalar_lea.vmem %s3310_s0, %s2606_s18  ;;  %s3312_s18 = smov 112  }
  0x2b   : > { %1192 = vrot.lane.b32.xlu0 %v2877_v17, %s3296_s26  ;;  %v2894_v27 = vld [vmem:[%s411_s20] sm:$0xff]  ;;  %s3314_s20 = smov 111  }
  0x2e   : > { %1089 = vrot.lane.b32.xlu1 %v459_v19, %s3298_s28 }
  0x32   : > { %1295 = vrot.lane.b32.xlu1 %v688_v18, %s3294_s29 }
  0x94   : > { %v483_v24 = vpop.permute.xlu1 %482 }
  0x95   : > { %v417_v25 = vpop.permute.xlu0 %416  ;;  %v484_v45 = vrot.slane %v483_v24, 4 }
  0x96   : > { %v424_v26 = vrot.slane %v417_v25, %v423_v23 }
  0x97   : > { %v486_v51 = vsel %vm485_vm1, %v484_v45, %v483_v24 }
  0x98   : > { %v461_v28 = vpop.permute.xlu1 %460  ;;  %v426_v30 = vmul.f32 %v424_v26, %v2894_v27 }
  0x99   : > { %v431_v29 = vpop.permute.xlu0 %430  ;;  %v462_v54 = vrot.slane %v461_v28, 4 }
  0x9a   : > { %v438_v31 = vrot.slane %v431_v29, %v423_v23 }
  0x9b   : > { %v464_v58 = vsel %vm463_vm2, %v462_v54, %v461_v28  ;;  %v1294_v28 = vld [vmem:[#allocation2 + $0xc] sm:$0xf] }
  0x9c   : > { %v440_v32 = vadd.f32 %v438_v31, %v426_v30  ;;  %v795_v33 = vpop.permute.xlu1 %794  ;;  %v1396_v30 = vld [vmem:[%s3278_s5] sm:$0xff] }
  0x9d   : > { %v690_v34 = vpop.permute.xlu0 %689  ;;  %v796_v0 = vrot.slane %v795_v33, 4  ;;  %v1404_v31 = vld [vmem:[%s3279_s6] sm:$0xff] }
  0x9e   : > { %vm441_vm0 = vcmp.ge.f32.partialorder %v440_v32, 0.0  ;;  %v442_v35 = vmul.f32 0.01, %v440_v32  ;;  %v691_v56 = vrot.slane %v690_v34, 4 }
  0x9f   : > { %v798_v3 = vsel %vm797_vm4, %v796_v0, %v795_v33 }
  0xa0   : > { %v2897_v36 = vsel %vm441_vm0, %v440_v32, %v442_v35  ;;  %v1090_v38 = vpop.permute.xlu1 %1089  ;;  %v693_v61 = vsel %vm692_vm3, %v691_v56, %v690_v34  ;;  %v2579_v32 = vld [vmem:[%s3274_s1 + $0x2] sm:$0x3]  ;;  %v1435_v35 = vld [vmem:[%s3274_s1] sm:$0x3] }
  0xa1   : > { %446 = vst [vmem:[#allocation2 + $0x4] sm:$0xff] %v2897_v36  ;;  %v1091_v39 = vrot.slane %v1090_v38, 4  ;;  %v987_v41 = vpop.permute.xlu0 %986  ;;  %v2946_v33 = vrot.slane %v2579_v32, %v2860_v7  ;;  %v1412_v34 = vld [vmem:[%s3280_s7] sm:$0xff] }
  0xa2   : > { %v988_v42 = vrot.slane %v987_v41, 4 }
  0xa3   : > { %v1096_v43 = vmul.f32 %v1091_v39, %v1088_v37  ;;  %v1092_v6 = vsel %vm709_vm6, %v1091_v39, %v1090_v38  ;;  %v2957_v37 = vrot.slane %v2579_v32, %v2862_v8  ;;  %v1440_v38 = vrot.slane %v1435_v35, %v2860_v7  ;;  %v2583_v39 = vld [vmem:[%s3274_s1 + $0x4] sm:$0x3] }
  0xa4   : > { %v993_v44 = vmul.f32 %v988_v42, %v985_v40  ;;  %v989_v4 = vsel %vm814_vm5, %v988_v42, %v987_v41  ;;  %v1095_v12 = vmul.f32 %v1092_v6, %v2897_v36  ;;  %v1296_v13 = vpop.permute.xlu1 %1295  ;;  %v1444_v40 = vrot.slane %v1435_v35, %v2862_v8 }
  0xa5   : > { %v1193_v47 = vpop.permute.xlu0 %1192  ;;  %1106 = vrot.lane.b32.xlu0 %v1096_v43, %s3300_s17  ;;  %v992_v9 = vmul.f32 %v989_v4, %v2897_v36  ;;  %v1297_v16 = vrot.slane %v1296_v13, 4  ;;  %v1662_v41 = vrot.slane %v2583_v39, %v2860_v7  ;;  %v1666_v42 = vrot.slane %v2583_v39, %v2862_v8 }
  0xa6   : > { %v1194_v48 = vrot.slane %v1193_v47, 4  ;;  %1003 = vrot.lane.b32.xlu1 %v993_v44, %s3311_s16  ;;  %v1101_v23 = vcombine.high %v1095_v12, %v1095_v12 }
  0xa7   : > { %v1298_v20 = vsel %vm594_vm8, %v1297_v16, %v1296_v13  ;;  %v998_v24 = vcombine.high %v992_v9, %v992_v9  ;;  %v1302_v29 = vmul.f32 %v1297_v16, %v1294_v28  ;;  %v2563_v16 = vld [vmem:[%s3277_s4 + $0x28] sm:$0xff] }
  0xa8   : > { %v792_v49 = vld [vmem:[#allocation2] sm:$0xff]  ;;  %v1199_v50 = vmul.f32 %v1194_v48, %v1191_v46  ;;  %v448_v52 = vld [vmem:[#allocation2 + $0x8] sm:$0xf]  ;;  %v1195_v11 = vsel %vm502_vm7, %v1194_v48, %v1193_v47  ;;  %v1301_v22 = vmul.f32 %v1298_v20, %v2897_v36 }
  0xa9   : > { %v489_v53 = vmul.f32 %v792_v49, %v486_v51  ;;  %v490_v55 = vmul.f32 %v484_v45, %v448_v52  ;;  %v468_v57 = vmul.f32 %v462_v54, %v448_v52  ;;  %v467_v59 = vmul.f32 %v792_v49, %v464_v58  ;;  %v676_v60 = vld [vmem:[#allocation2 + $0x8] sm:$0xf]  ;;  %v469_v58 = vld [vmem:[%s3277_s4] sm:$0xff] }
  0xaa   : > { %1209 = vrot.lane.b32.xlu1 %v1199_v50, %s3312_s18  ;;  %v696_v62 = vmul.f32 %v792_v49, %v693_v61  ;;  %v793_v63 = vld [vmem:[#allocation2 + $0x8] sm:$0xf]  ;;  %v697_v1 = vmul.f32 %v691_v56, %v676_v60  ;;  %v801_v5 = vmul.f32 %v798_v3, %v792_v49  ;;  %v1198_v14 = vmul.f32 %v1195_v11, %v2897_v36  ;;  %v2555_v3 = vld [vmem:[%s3277_s4 + $0x18] sm:$0xff] }
  0xab   : > { %496 = vrot.lane.b32.xlu0 %v489_v53, %s3296_s26  ;;  %v802_v2 = vmul.f32 %v796_v0, %v793_v63  ;;  %v587_v15 = vcombine.high %v467_v59, %v467_v59  ;;  %v495_v18 = vcombine.high %v489_v53, %v489_v53  ;;  %v1307_v25 = vcombine.high %v1301_v22, %v1301_v22 }
  0xac   : > { %v807_v19 = vcombine.high %v801_v5, %v801_v5  ;;  %v702_v21 = vcombine.high %v696_v62, %v696_v62  ;;  %v1204_v26 = vcombine.high %v1198_v14, %v1198_v14  ;;  %v899_v0 = vmul.f32 %v2877_v17, %v2897_v36  ;;  %v2551_v36 = vld [vmem:[%s3277_s4 + $0x10] sm:$0xff] }
  0xae   : > { %500 = vrot.lane.b32.xlu1 %v490_v55, %s3296_s26 }
  0xaf   : > { %592 = vrot.lane.b32.xlu0 %v468_v57, %s3294_s29 }
  0xb2   : > { %588 = vrot.lane.b32.xlu1 %v467_v59, %s3294_s29 }
  0xb3   : > { %703 = vrot.lane.b32.xlu0 %v696_v62, %s3298_s28  ;;  %v2543_v62 = vld [vmem:[%s3277_s4 + $0x8] sm:$0xff] }
  0xb6   : > { %707 = vrot.lane.b32.xlu1 %v697_v1, %s3298_s28 }
  0xb7   : > { %812 = vrot.lane.b32.xlu0 %v802_v2, %s3313_s19 }
  0xba   : > { %808 = vrot.lane.b32.xlu1 %v801_v5, %s3313_s19 }
  0xbb   : > { %999 = vrot.lane.b32.xlu0 %v992_v9, %s3311_s16  ;;  %v903_v9 = vcombine.high %v899_v0, %v899_v0 }
  0xbe   : > { %1102 = vrot.lane.b32.xlu1 %v1095_v12, %s3300_s17 }
  0xbf   : > { %1205 = vrot.lane.b32.xlu0 %v1198_v14, %s3312_s18 }
  0xc2   : > { %590 = vrot.lane.b32.xlu1 %v587_v15, %s3294_s29  ;;  %v2559_v15 = vld [vmem:[%s3277_s4 + $0x20] sm:$0xff]  ;;  %s2539_s29 = sshll.u32 %s404_s15, 4 }
  0xc3   : > { %498 = vrot.lane.b32.xlu0 %v495_v18, %s3296_s26  ;;  %s3318_s26 = smov 17  }
  0xc6   : > { %810 = vrot.lane.b32.xlu1 %v807_v19, %s3313_s19 }
  0xc7   : > { %705 = vrot.lane.b32.xlu0 %v702_v21, %s3298_s28 }
  0xca   : > { %1104 = vrot.lane.b32.xlu1 %v1101_v23, %s3300_s17  ;;  %v2567_v23 = vld [vmem:[%s3277_s4 + $0x30] sm:$0xff] }
  0xcb   : > { %1001 = vrot.lane.b32.xlu0 %v998_v24, %s3311_s16  ;;  %v2571_v24 = vld [vmem:[%s3277_s4 + $0x38] sm:$0xff] }
  0xce   : > { %1310 = vrot.lane.b32.xlu1 %v1307_v25, %s3314_s20 }
  0xcf   : > { %1207 = vrot.lane.b32.xlu0 %v1204_v26, %s3312_s18 }
  0xd2   : > { %1308 = vrot.lane.b32.xlu1 %v1301_v22, %s3314_s20 }
  0xd3   : > { %1312 = vrot.lane.b32.xlu0 %v1302_v29, %s3314_s20  ;;  %v2575_v29 = vld [vmem:[%s3277_s4 + $0x40] sm:$0xff] }
  0xd6   : > { %1407 = vperm.xlu1 %2659, %v1404_v31  }
  0xd7   : > { %1399 = vperm.xlu0 %2658, %v1396_v30  }
  0xda   : > { %1469 = vrot.lane.b32.xlu1 %v2946_v33, %s3312_s18 }
  0xdb   : > { %1415 = vperm.xlu0 %2658, %v1412_v34  }
  0xde   : > { %1445 = vrot.lane.b32.xlu1 %v1440_v38, %s3314_s20 }
  0xdf   : > { %1471 = vrot.lane.b32.xlu0 %v2957_v37, %s3312_s18 }
  0xe2   : > { %1667 = vrot.lane.b32.xlu1 %v1662_v41, %s3315_s2 }
  0xe3   : > { %1447 = vrot.lane.b32.xlu0 %v1444_v40, %s3314_s20 }
  0xe6   : > { %1769 = vrot.lane.b32.xlu1 %v1440_v38, %s3311_s16 }
  0xe7   : > { %1669 = vrot.lane.b32.xlu0 %v1666_v42, %s3315_s2 }
  0xea   : > { %1954 = vrot.lane.b32.xlu1 %v1662_v41, %s3313_s19 }
  0xeb   : > { %1771 = vrot.lane.b32.xlu0 %v1444_v40, %s3311_s16 }
  0xee   : > { %2056 = vrot.lane.b32.xlu1 %v1440_v38, %s3316_s3 }
  0xef   : > { %1956 = vrot.lane.b32.xlu0 %v1666_v42, %s3313_s19 }
  0xf2   : > { %2158 = vrot.lane.b32.xlu1 %v2946_v33, %s3317_s30 }
  0xf3   : > { %2058 = vrot.lane.b32.xlu0 %v1444_v40, %s3316_s3 }
  0xf6   : > { %2260 = vrot.lane.b32.xlu1 %v1662_v41, %s3318_s26 }
  0xf7   : > { %2160 = vrot.lane.b32.xlu0 %v2957_v37, %s3317_s30 }
  0xfb   : > { %2262 = vrot.lane.b32.xlu0 %v1666_v42, %s3318_s26 }
 0x117   : > { %v1107_v8 = vpop.permute.xlu0 %1106 }
 0x118   : > { %v1004_v7 = vpop.permute.xlu1 %1003 }
 0x11c   : > { %v2984_v43 = vpop.permute.xlu1 %1209 }
 0x11d   : > { %v497_v44 = vpop.permute.xlu0 %496 }
 0x120   : > { %v501_v45 = vpop.permute.xlu1 %500 }
 0x121   : > { %v593_v46 = vpop.permute.xlu0 %592 }
 0x124   : > { %v589_v47 = vpop.permute.xlu1 %588 }
 0x125   : > { %v704_v48 = vpop.permute.xlu0 %703 }
 0x128   : > { %v708_v49 = vpop.permute.xlu1 %707 }
 0x129   : > { %v813_v50 = vpop.permute.xlu0 %812 }
 0x12c   : > { %v809_v51 = vpop.permute.xlu1 %808 }
 0x12d   : > { %v1000_v52 = vpop.permute.xlu0 %999 }
 0x130   : > { %v1103_v53 = vpop.permute.xlu1 %1102 }
 0x131   : > { %v1206_v54 = vpop.permute.xlu0 %1205 }
 0x134   : > { %v591_v55 = vpop.permute.xlu1 %590 }
 0x135   : > { %v596_v56 = vsel %vm594_vm8, %v591_v55, %v593_v46  ;;  %v595_v57 = vsel %vm594_vm8, %v589_v47, %v591_v55  ;;  %v499_v59 = vpop.permute.xlu0 %498 }
 0x136   : > { %2547 = vmatprep.subr.msk.mxu1 %vm509_vm9, %v596_v56  ;;  %v504_v60 = vsel %vm502_vm7, %v499_v59, %v501_v45  ;;  %v503_v61 = vsel %vm502_vm7, %v497_v44, %v499_v59 }
 0x137   : > { %2548 = vmatpush1.msk.msra.mxu1 %vm509_vm9, %v595_v57  ;;  %2544 = vmatprep.subr.msk.mxu0 %vm509_vm9, %v504_v60 }
 0x138   : > { %v811_v63 = vpop.permute.xlu1 %810  ;;  %2549 = vmatmul.mubr.msk.f32.vlgmr.msra.gmra.mxu1 %vm505_vm10, %v469_v58  ;;  %2545 = vmatpush1.msk.msra.mxu0 %vm509_vm9, %v503_v61 }
 0x139   : > { %v815_v1 = vsel %vm814_vm5, %v809_v51, %v811_v63  ;;  %v816_v2 = vsel %vm814_vm5, %v811_v63, %v813_v50  ;;  %888 = vmatprep.mubr.f32.mxu1 %v2724_v10  ;;  %2546 = vmatmul.mubr.msk.f32.vlgmr.msra.gmra.mxu0 %vm505_vm10, %v2543_v62  ;;  %v706_v4 = vpop.permute.xlu0 %705 }
 0x13a   : > { %2556 = vmatprep.subr.msk.mxu1 %vm509_vm9, %v816_v2  ;;  %v710_v5 = vsel %vm709_vm6, %v704_v48, %v706_v4  ;;  %v711_v17 = vsel %vm709_vm6, %v706_v4, %v708_v49  ;;  %783 = vmatprep.mubr.f32.mxu0 %v2724_v10 }
 0x13b   : > { %2557 = vmatpush1.msk.msra.mxu1 %vm509_vm9, %v815_v1  ;;  %2552 = vmatprep.subr.msk.mxu0 %vm509_vm9, %v711_v17 }
 0x13c   : > { %v1105_v6 = vpop.permute.xlu1 %1104  ;;  %2558 = vmatmul.mubr.msk.f32.vlgmr.msra.gmra.mxu1 %vm505_vm10, %v2555_v3  ;;  %2553 = vmatpush1.msk.msra.mxu0 %vm509_vm9, %v710_v5 }
 0x13d   : > { %v1109_v11 = vsel %vm692_vm3, %v1105_v6, %v1107_v8  ;;  %1078 = vmatprep.mubr.f32.mxu1 %v2724_v10  ;;  %v1002_v12 = vpop.permute.xlu0 %1001  ;;  %2554 = vmatmul.mubr.msk.f32.vlgmr.msra.gmra.mxu0 %vm505_vm10, %v2551_v36  ;;  %v1108_v19 = vsel %vm692_vm3, %v1103_v53, %v1105_v6 }
 0x13e   : > { %2560 = vmatprep.subr.msk.mxu0 %vm509_vm9, %v903_v9  ;;  %v1005_v13 = vsel %vm797_vm4, %v1000_v52, %v1002_v12  ;;  %v1006_v14 = vsel %vm797_vm4, %v1002_v12, %v1004_v7  ;;  %975 = vmatprep.mubr.f32.mxu0 %v2724_v10 }
 0x13f   : > { %2561 = vmatpush1.msk.msra.mxu0 %vm509_vm9, %v899_v0  ;;  %2564 = vmatprep.subr.msk.mxu1 %vm509_vm9, %v1006_v14 }
 0x140   : > { %2568 = vmatprep.subr.msk.mxu0 %vm509_vm9, %v1109_v11  ;;  %v1311_v18 = vpop.permute.xlu1 %1310  ;;  %2565 = vmatpush1.msk.msra.mxu1 %vm509_vm9, %v1005_v13 }
 0x141   : > { %v1208_v20 = vpop.permute.xlu0 %1207  ;;  %2562 = vmatmul.mubr.msk.f32.vlgmr.msra.gmra.mxu0 %vm505_vm10, %v2559_v15  ;;  %2566 = vmatmul.mubr.msk.f32.vlgmr.msra.gmra.mxu1 %vm505_vm10, %v2563_v16 }
 0x142   : > { %v1211_v21 = vsel %vm485_vm1, %v1206_v54, %v1208_v20  ;;  %v1212_v22 = vsel %vm485_vm1, %v1208_v20, %v2984_v43  ;;  %2569 = vmatpush1.msk.msra.mxu0 %vm509_vm9, %v1108_v19  ;;  %1181 = vmatprep.mubr.f32.mxu0 %v2724_v10 }
 0x143   : > { %2572 = vmatprep.subr.msk.mxu1 %vm509_vm9, %v1212_v22  ;;  %1284 = vmatprep.mubr.f32.mxu1 %v2724_v10 }
 0x144   : > { %2573 = vmatpush1.msk.msra.mxu1 %vm509_vm9, %v1211_v21  ;;  %v1309_v25 = vpop.permute.xlu1 %1308 }
 0x145   : > { %v1313_v26 = vpop.permute.xlu0 %1312  ;;  %2570 = vmatmul.mubr.msk.f32.vlgmr.msra.gmra.mxu0 %vm505_vm10, %v2567_v23  ;;  %2574 = vmatmul.mubr.msk.f32.vlgmr.msra.gmra.mxu1 %vm505_vm10, %v2571_v24  ;;  %v1314_v30 = vsel %vm463_vm2, %v1309_v25, %v1311_v18 }
 0x146   : > { %v1315_v28 = vsel %vm463_vm2, %v1311_v18, %v1313_v26  ;;  %1387 = vmatprep.mubr.f32.mxu0 %v2724_v10  ;;  %1563 = vmatprep.mubr.f32.mxu1 %v2724_v10 }
 0x147   : > { %2576 = vmatprep.subr.msk.mxu0 %vm509_vm9, %v1315_v28 }
 0x148   : > { %2577 = vmatpush1.msk.msra.mxu0 %vm509_vm9, %v1314_v30 }
 0x149   : > { %2578 = vmatmul.mubr.msk.f32.vlgmr.msra.gmra.mxu0 %vm505_vm10, %v2575_v29 }
 0x14a   : > { %1650 = vmatprep.mubr.f32.mxu0 %v2724_v10 }
 0x151   : > { %v3068_v31 = vpop.permute.xlu1 %1407 }
 0x152   : > { %v1400_v35 = vpop.permute.xlu0 %1399 }
 0x155   : > { %v3070_v32 = vpop.permute.xlu1 %1469 }
 0x156   : > { %v1477_v34 = vmul.f32 0.0, %v3070_v32  ;;  %v3074_v38 = vpop.permute.xlu0 %1415 }
 0x158   : > { %1485 = vrot.lane.b32.xlu1 %v1477_v34, %s3317_s30 }
 0x159   : > { %v1446_v40 = vpop.permute.xlu1 %1445 }
 0x15a   : > { %v3076_v39 = vpop.permute.xlu0 %1471  ;;  %v1453_v41 = vmul.f32 0.0, %v1446_v40 }
 0x15b   : > { %v1473_v30 = vsel %vm485_vm1, %v3070_v32, %v3076_v39 }
 0x15c   : > { %1573 = vrot.lane.b32.xlu0 %v1453_v41, %s3318_s26 }
 0x15d   : > { %v3081_v7 = vpop.permute.xlu1 %1667 }
 0x15e   : > { %v3078_v42 = vpop.permute.xlu0 %1447  ;;  %v1675_v8 = vmul.f32 0.0, %v3081_v7 }
 0x15f   : > { %v1449_v41 = vsel %vm463_vm2, %v1446_v40, %v3078_v42 }
 0x160   : > { %1683 = vrot.lane.b32.xlu1 %v1675_v8, %s3316_s3 }
 0x161   : > { %v1770_v44 = vpop.permute.xlu1 %1769 }
 0x162   : > { %v3084_v43 = vpop.permute.xlu0 %1669  ;;  %v1777_v45 = vmul.f32 0.0, %v1770_v44 }
 0x164   : > { %1785 = vrot.lane.b32.xlu0 %v1777_v45, %s3313_s19 }
 0x166   : > { %v3087_v46 = vpop.permute.xlu0 %1771 }
 0x167   : > { %v1773_v32 = vsel %vm797_vm4, %v1770_v44, %v3087_v46 }
 0x16a   : > { %v3090_v47 = vpop.permute.xlu0 %1956 }
 0x16b   : > { %v1964_v48 = vmul.f32 0.0, %v3090_v47 }
 0x16d   : > { %1974 = vrot.lane.b32.xlu0 %v1964_v48, %s3311_s16  ;;  %v1955_v48 = vpop.permute.xlu1 %1954 }
 0x16e   : > { %v3094_v49 = vpop.permute.xlu0 %2058 }
 0x16f   : > { %v2066_v50 = vmul.f32 0.0, %v3094_v49 }
 0x171   : > { %2076 = vrot.lane.b32.xlu1 %v2066_v50, %s3315_s2 }
 0x1f8   : > { %v670_v51 = vpop.f32.mrf.mxu1 }
 0x1f9   : > { %v580_v52 = vpop.f32.mrf.mxu0 }
 0x1fa   : > { %v672_v53 = vpop.f32.mrf.mxu1  ;;  %v671_v56 = vadd.f32 %v670_v51, %v580_v52 }
 0x1fb   : > { %v582_v54 = vpop.f32.mrf.mxu0 }
 0x1fc   : > { %v890_v55 = vpop.f32.mrf.mxu1  ;;  %v673_v59 = vadd.f32 %v672_v53, %v582_v54 }
 0x1fd   : > { %v785_v57 = vpop.f32.mrf.mxu0 }
 0x1fe   : > { %v892_v58 = vpop.f32.mrf.mxu1  ;;  %v790_v60 = vadd.f32 %v785_v57, %v671_v56  ;;  %v2161_v57 = vpop.permute.xlu0 %2160 }
 0x1ff   : > { %v787_v61 = vpop.f32.mrf.mxu0 }
 0x200   : > { %v895_v62 = vadd.f32 %v890_v55, %v790_v60  ;;  %v791_v63 = vadd.f32 %v787_v61, %v673_v59  ;;  %v2168_v59 = vmul.f32 0.0, %v2161_v57 }
 0x201   : > { %v977_v0 = vpop.f32.mrf.mxu0  ;;  %v1080_v1 = vpop.f32.mrf.mxu1 }
 0x202   : > { %v896_v2 = vadd.f32 %v892_v58, %v791_v63  ;;  %v982_v3 = vadd.f32 %v977_v0, %v895_v62  ;;  %v2263_v61 = vpop.permute.xlu0 %2262 }
 0x203   : > { %v979_v4 = vpop.f32.mrf.mxu0  ;;  %v1082_v5 = vpop.f32.mrf.mxu1 }
 0x204   : > { %v1085_v17 = vadd.f32 %v1080_v1, %v982_v3  ;;  %v983_v36 = vadd.f32 %v979_v4, %v896_v2  ;;  %v2362_v3 = vld [vmem:[%s3282_s9] sm:$0xff] }
 0x205   : > { %v1183_v6 = vpop.f32.mrf.mxu0  ;;  %v1286_v9 = vpop.f32.mrf.mxu1  ;;  %v2371_v4 = vld [vmem:[%s3284_s11] sm:$0xff] }
 0x206   : > { %v1086_v11 = vadd.f32 %v1082_v5, %v983_v36  ;;  %v1188_v12 = vadd.f32 %v1183_v6, %v1085_v17  ;;  %v1574_v5 = vpop.permute.xlu0 %1573 }
 0x207   : > { %v1185_v13 = vpop.f32.mrf.mxu0  ;;  %v1288_v16 = vpop.f32.mrf.mxu1 }
 0x208   : > { %v1291_v14 = vadd.f32 %v1286_v9, %v1188_v12  ;;  %v1189_v15 = vadd.f32 %v1185_v13, %v1086_v11 }
 0x209   : > { %v1389_v18 = vpop.f32.mrf.mxu0 }
 0x20a   : > { %v1292_v19 = vadd.f32 %v1288_v16, %v1189_v15  ;;  %v1394_v20 = vadd.f32 %v1389_v18, %v1291_v14  ;;  %v1786_v6 = vpop.permute.xlu0 %1785 }
 0x20b   : > { %v1391_v21 = vpop.f32.mrf.mxu0 }
 0x20c   : > { %v1402_v22 = vadd.f32 %v1400_v35, %v1394_v20  ;;  %v1395_v23 = vadd.f32 %v1391_v21, %v1292_v19 }
 0x20e   : > { %v1410_v24 = vmul.f32 %v3068_v31, %v1402_v22  ;;  %v1403_v25 = vadd.f32 %v1400_v35, %v1395_v23  ;;  %v1975_v11 = vpop.permute.xlu0 %1974  ;;  %v1456_v22 = vld [vmem:[%s3281_s8] sm:$0xff] }
 0x210   : > { %v1418_v26 = vadd.f32 %v3074_v38, %v1410_v24  ;;  %v1411_v29 = vmul.f32 %v3068_v31, %v1403_v25  ;;  %v1671_v31 = vsel %vm692_vm3, %v3081_v7, %v3084_v43  ;;  %v2580_v25 = vld [vmem:[%s3281_s8 + $0x8] sm:$0xff] }
 0x212   : > { %vm1420_vm11 = vcmp.ge.f32.partialorder %v1418_v26, 0.0  ;;  %v1422_v28 = vmul.f32 0.01, %v1418_v26  ;;  %v1419_v45 = vadd.f32 %v3074_v38, %v1411_v29  ;;  %v2057_v38 = vpop.permute.xlu1 %2056 }
 0x214   : > { %v3104_v34 = vsel %vm1420_vm11, %v1418_v26, %v1422_v28  ;;  %v1423_v50 = vmul.f32 0.01, %v1419_v45  ;;  %vm1421_vm12 = vcmp.ge.f32.partialorder %v1419_v45, 0.0 }
 0x215   : > { %v1478_v8 = vmul.f32 %v1473_v30, %v3104_v34  ;;  %v1454_v35 = vmul.f32 %v1449_v41, %v3104_v34  ;;  %v1676_v40 = vmul.f32 %v1671_v31, %v3104_v34  ;;  %v1778_v51 = vmul.f32 %v1773_v32, %v3104_v34  ;;  %v2584_v41 = vld [vmem:[%s3281_s8 + $0x10] sm:$0xff] }
 0x216   : > { %v1962_v52 = vmul.f32 %v1955_v48, %v3104_v34  ;;  %v3123_v53 = vsel %vm1421_vm12, %v1419_v45, %v1423_v50  ;;  %v2064_v7 = vmul.f32 %v2057_v38, %v3104_v34  ;;  %v2159_v55 = vpop.permute.xlu1 %2158 }
 0x217   : > { %1487 = vrot.lane.b32.xlu1 %v1478_v8, %s3317_s30  ;;  %1575 = vrot.lane.b32.xlu0 %v1454_v35, %s3318_s26  ;;  %v1455_v44 = vmul.f32 %v3078_v42, %v3123_v53  ;;  %v1479_v54 = vmul.f32 %v3076_v39, %v3123_v53  ;;  %v2166_v56 = vmul.f32 %v2159_v55, %v3104_v34 }
 0x218   : > { %v1677_v58 = vmul.f32 %v3084_v43, %v3123_v53  ;;  %v1779_v42 = vmul.f32 %v3087_v46, %v3123_v53  ;;  %v1958_v39 = vsel %vm814_vm5, %v1955_v48, %v3090_v47  ;;  %v2060_v43 = vsel %vm709_vm6, %v2057_v38, %v3094_v49 }
 0x219   : > { %v1963_v62 = vmul.f32 %v1958_v39, %v3123_v53  ;;  %v2065_v63 = vmul.f32 %v2060_v43, %v3123_v53  ;;  %v2162_v0 = vsel %vm502_vm7, %v2159_v55, %v2161_v57  ;;  %v2270_v49 = vmul.f32 0.0, %v2263_v61  ;;  %v2370_v43 = vld [vmem:[%s3283_s10] sm:$0xff] }
 0x21a   : > { %v2261_v60 = vpop.permute.xlu1 %2260  ;;  %v2167_v47 = vmul.f32 %v2162_v0, %v3123_v53  ;;  %v1872_v45 = vmul.f32 %v2957_v37, %v3123_v53  ;;  %v1871_v48 = vmul.f32 %v2946_v33, %v3104_v34  ;;  %v2588_v37 = vld [vmem:[%s3281_s8 + $0x20] sm:$0xff] }
 0x21b   : > { %1685 = vrot.lane.b32.xlu1 %v1676_v40, %s3316_s3  ;;  %1787 = vrot.lane.b32.xlu0 %v1778_v51, %s3313_s19  ;;  %v2264_v46 = vsel %vm594_vm8, %v2261_v60, %v2263_v61  ;;  %v2268_v2 = vmul.f32 %v2261_v60, %v3104_v34  ;;  %v2586_v40 = vld [vmem:[%s3281_s8 + $0x18] sm:$0xff]  ;;  %v2596_v61 = vld [vmem:[%s3281_s8 + $0x40] sm:$0xff] }
 0x21c   : > { %v2269_v1 = vmul.f32 %v2264_v46, %v3123_v53 }
 0x21e   : > { %v1486_v17 = vpop.permute.xlu1 %1485 }
 0x21f   : > { %1970 = vrot.lane.b32.xlu1 %v1962_v52, %s3311_s16  ;;  %2072 = vrot.lane.b32.xlu0 %v2064_v7, %s3315_s2  ;;  %v2590_v52 = vld [vmem:[%s3281_s8 + $0x28] sm:$0xff] }
 0x222   : > { %v1684_v36 = vpop.permute.xlu1 %1683 }
 0x223   : > { %1577 = vrot.lane.b32.xlu1 %v1455_v44, %s3318_s26  ;;  %1489 = vrot.lane.b32.xlu0 %v1479_v54, %s3317_s30  ;;  %v2592_v44 = vld [vmem:[%s3281_s8 + $0x30] sm:$0xff]  ;;  %v2378_v54 = vcombine.high %v2894_v27, %v2894_v27  ;;  %s2462_s30 = scalar_lea.sflag [#allocation5], %s404_s15 }
 0x226   : > { %v2077_v9 = vpop.permute.xlu1 %2076 }
 0x227   : > { %2174 = vrot.lane.b32.xlu1 %v2166_v56, %s3312_s18  ;;  %1687 = vrot.lane.b32.xlu0 %v1677_v58, %s3316_s3  ;;  %s406_s3 = scalar_lea.vmem [#allocation4], %s2539_s29 }
 0x22b   : > { %1789 = vrot.lane.b32.xlu1 %v1779_v42, %s3313_s19  ;;  %2178 = vrot.lane.b32.xlu0 %v2168_v59, %s3312_s18  ;;  %v2594_v59 = vld [vmem:[%s3281_s8 + $0x38] sm:$0xff]  ;;  %s2607_s19 = sshll.u32 %s2821_s25, 8  ;;  %s2734_s25 = smov [#allocation4]  }
 0x22c   : > { %s2665_s0 = sshll.u32 %s2734_s25, 4  ;;  %s2666_s0 = int_to_ptr.vmem [resolvable:$false] %s2665_s0 }
 0x22d   : > { %s2667_s17 = scalar_lea.vmem %s2666_s0, 512 }
 0x22f   : > { %1972 = vrot.lane.b32.xlu1 %v1963_v62, %s3311_s16  ;;  %2074 = vrot.lane.b32.xlu0 %v2065_v63, %s3315_s2  ;;  %s2476_s16 = sshll.u32 %s406_s3, 4  ;;  %s2477_s16 = int_to_ptr.vmem [resolvable:$true] %s2476_s16 }
 0x230   : > { %s2661_s26 = scalar_lea.vmem %s2477_s16, 256  ;;  %p2668_p0 = scmp.lt.s32.totalorder %s2477_s16, %s2666_s0 }
 0x231   : > { %p2662_p11 = scmp.ne.s32.totalorder %s2477_s16, %s2661_s26  ;;  %p2669_p1 = scmp.lt.s32.totalorder %s2667_s17, %s2661_s26 }
 0x233   : > { %2176 = vrot.lane.b32.xlu1 %v2167_v47, %s3312_s18  ;;  %2278 = vrot.lane.b32.xlu0 %v2269_v1, %s3314_s20  ;;  %p2663_p12 = pnand %p2662_p11, %p2838_p5  ;;  %p2670_p2 = por %p2669_p1, %p2668_p0 }
 0x235   : > { %p2664_p13 = pneg %p2663_p12 }
 0x237   : > { %2280 = vrot.lane.b32.xlu1 %v2270_v49, %s3314_s20  ;;  %2276 = vrot.lane.b32.xlu0 %v2268_v2, %s3314_s20  ;;  %s2474_s20 = scalar_lea.hbm %s3285_s12, %s2607_s19  ;;  %p2671_p3 = pnand %p2670_p2, %p2664_p13 }
 0x23b   : > { %2365 = vperm.xlu1 %2659, %v2362_v3   ;;  %2374 = vperm.xlu0 %2658, %v2371_v4  }
 0x289   : > { %v1488_v12 = vpop.permute.xlu1 %1487  ;;  %v1576_v13 = vpop.permute.xlu0 %1575 }
 0x28a   : > { %v1579_v23 = vsel %vm594_vm8, %v1574_v5, %v1576_v13  ;;  %v1491_v26 = vsel %vm502_vm7, %v1486_v17, %v1488_v12 }
 0x28d   : > { %v1686_v14 = vpop.permute.xlu1 %1685  ;;  %v1788_v15 = vpop.permute.xlu0 %1787 }
 0x28e   : > { %v1689_v8 = vsel %vm709_vm6, %v1684_v36, %v1686_v14  ;;  %v1791_v50 = vsel %vm814_vm5, %v1786_v6, %v1788_v15 }
 0x291   : > { %v1971_v16 = vpop.permute.xlu1 %1970  ;;  %v2073_v18 = vpop.permute.xlu0 %2072 }
 0x295   : > { %v1578_v19 = vpop.permute.xlu1 %1577  ;;  %v1490_v20 = vpop.permute.xlu0 %1489 }
 0x296   : > { %v1580_v21 = vsel %vm594_vm8, %v1576_v13, %v1578_v19  ;;  %v1492_v24 = vsel %vm502_vm7, %v1488_v12, %v1490_v20 }
 0x297   : > { %1616 = vmatprep.subr.mxu0 %v1580_v21  ;;  %1529 = vmatprep.subr.mxu1 %v1492_v24 }
 0x298   : > { %1617 = vmatpush1.msra.mxu0 %v1579_v23  ;;  %1530 = vmatpush1.msra.mxu1 %v1491_v26 }
 0x299   : > { %v2175_v28 = vpop.permute.xlu1 %2174  ;;  %2582 = vmatmul.mubr.msk.f32.vlgmr.msra.gmra.mxu0 %vm1495_vm13, %v1456_v22  ;;  %v1688_v29 = vpop.permute.xlu0 %1687  ;;  %2581 = vmatmul.mubr.msk.f32.vlgmr.msra.gmra.mxu1 %vm1495_vm13, %v2580_v25 }
 0x29a   : > { %1862 = vmatprep.mubr.f32.mxu0 %v2724_v10  ;;  %v1690_v30 = vsel %vm709_vm6, %v1686_v14, %v1688_v29  ;;  %1760 = vmatprep.mubr.f32.mxu1 %v2724_v10 }
 0x29b   : > { %1726 = vmatprep.subr.mxu1 %v1690_v30 }
 0x29c   : > { %1727 = vmatpush1.msra.mxu1 %v1689_v8 }
 0x29d   : > { %v1790_v35 = vpop.permute.xlu1 %1789  ;;  %v2179_v31 = vpop.permute.xlu0 %2178  ;;  %1908 = vmatprep.subr.mxu1 %v1872_v45  ;;  %2585 = vmatmul.mubr.msk.f32.vlgmr.msra.gmra.mxu1 %vm1495_vm13, %v2584_v41 }
 0x29e   : > { %v1792_v32 = vsel %vm814_vm5, %v1788_v15, %v1790_v35  ;;  %1909 = vmatpush1.msra.mxu1 %v1871_v48  ;;  %1942 = vmatprep.mubr.f32.mxu1 %v2724_v10 }
 0x29f   : > { %1828 = vmatprep.subr.mxu0 %v1792_v32 }
 0x2a0   : > { %1829 = vmatpush1.msra.mxu0 %v1791_v50 }
 0x2a1   : > { %2587 = vmatmul.mubr.msk.f32.vlgmr.msra.gmra.mxu0 %vm1495_vm13, %v2586_v40  ;;  %v1973_v33 = vpop.permute.xlu1 %1972  ;;  %v2075_v34 = vpop.permute.xlu0 %2074  ;;  %2589 = vmatmul.mubr.msk.f32.vlgmr.msra.gmra.mxu1 %vm1495_vm13, %v2588_v37 }
 0x2a2   : > { %v1976_v51 = vsel %vm797_vm4, %v1971_v16, %v1973_v33  ;;  %v1977_v38 = vsel %vm797_vm4, %v1973_v33, %v1975_v11  ;;  %2047 = vmatprep.mubr.f32.mxu0 %v2724_v10  ;;  %v2078_v53 = vsel %vm692_vm3, %v2073_v18, %v2075_v34  ;;  %v2079_v7 = vsel %vm692_vm3, %v2075_v34, %v2077_v9 }
 0x2a3   : > { %2013 = vmatprep.subr.mxu0 %v1977_v38  ;;  %2149 = vmatprep.mubr.f32.mxu1 %v2724_v10 }
 0x2a4   : > { %2115 = vmatprep.subr.mxu1 %v2079_v7  ;;  %2014 = vmatpush1.msra.mxu0 %v1976_v51 }
 0x2a5   : > { %2116 = vmatpush1.msra.mxu1 %v2078_v53  ;;  %2591 = vmatmul.mubr.msk.f32.vlgmr.msra.gmra.mxu0 %vm1495_vm13, %v2590_v52  ;;  %v2177_v55 = vpop.permute.xlu1 %2176  ;;  %v2279_v56 = vpop.permute.xlu0 %2278 }
 0x2a6   : > { %v2180_v57 = vsel %vm485_vm1, %v2175_v28, %v2177_v55  ;;  %v2181_v58 = vsel %vm485_vm1, %v2177_v55, %v2179_v31  ;;  %2593 = vmatmul.mubr.msk.f32.vlgmr.msra.gmra.mxu1 %vm1495_vm13, %v2592_v44  ;;  %2251 = vmatprep.mubr.f32.mxu0 %v2724_v10 }
 0x2a7   : > { %2217 = vmatprep.subr.mxu0 %v2181_v58  ;;  %2353 = vmatprep.mubr.f32.mxu1 %v2724_v10 }
 0x2a8   : > { %2218 = vmatpush1.msra.mxu0 %v2180_v57 }
 0x2a9   : > { %2595 = vmatmul.mubr.msk.f32.vlgmr.msra.gmra.mxu0 %vm1495_vm13, %v2594_v59  ;;  %v2281_v42 = vpop.permute.xlu1 %2280  ;;  %2598 = vmatprep.subr.msk.mxu0 %vm509_vm9, %v2378_v54  ;;  %v2277_v39 = vpop.permute.xlu0 %2276 }
 0x2aa   : > { %v2283_v60 = vsel %vm463_vm2, %v2279_v56, %v2281_v42  ;;  %2599 = vmatpush1.msk.msra.mxu0 %vm509_vm9, %v2894_v27  ;;  %2450 = vmatprep.mubr.f32.mxu0 %v2724_v10  ;;  %v2282_v62 = vsel %vm463_vm2, %v2277_v39, %v2279_v56 }
 0x2ab   : > { %2319 = vmatprep.subr.mxu1 %v2283_v60 }
 0x2ac   : > { %2320 = vmatpush1.msra.mxu1 %v2282_v62 }
 0x2ad   : > { %2597 = vmatmul.mubr.msk.f32.vlgmr.msra.gmra.mxu1 %vm1495_vm13, %v2596_v61  ;;  %2600 = vmatmul.mubr.msk.f32.vlgmr.msra.gmra.mxu0 %vm505_vm10, %v2370_v43 }
 0x2b6   : > { %v2375_v28 = vpop.permute.xlu0 %2374  ;;  %v2366_v29 = vpop.permute.xlu1 %2365 }
 0x359   : > { %v1652_v63 = vpop.f32.mrf.mxu0  ;;  %v1565_v27 = vpop.f32.mrf.mxu1 }
 0x35a   : > { %v1653_v0 = vadd.f32 %v1652_v63, %v1565_v27 }
 0x35b   : > { %v1654_v10 = vpop.f32.mrf.mxu0  ;;  %v1567_v46 = vpop.f32.mrf.mxu1 }
 0x35c   : > { %v1655_v47 = vadd.f32 %v1654_v10, %v1567_v46 }
 0x35d   : > { %v1762_v1 = vpop.f32.mrf.mxu1 }
 0x35e   : > { %v1767_v49 = vadd.f32 %v1762_v1, %v1653_v0 }
 0x35f   : > { %v1764_v2 = vpop.f32.mrf.mxu1 }
 0x360   : > { %v1768_v5 = vadd.f32 %v1764_v2, %v1655_v47 }
 0x361   : > { %v1864_v3 = vpop.f32.mrf.mxu0  ;;  %v1944_v17 = vpop.f32.mrf.mxu1 }
 0x362   : > { %v1869_v4 = vadd.f32 %v1864_v3, %v1767_v49 }
 0x363   : > { %v1866_v36 = vpop.f32.mrf.mxu0  ;;  %v1946_v11 = vpop.f32.mrf.mxu1 }
 0x364   : > { %v1870_v6 = vadd.f32 %v1866_v36, %v1768_v5  ;;  %v1949_v9 = vadd.f32 %v1944_v17, %v1869_v4 }
 0x365   : > { %v2049_v12 = vpop.f32.mrf.mxu0 }
 0x366   : > { %v2054_v13 = vadd.f32 %v2049_v12, %v1949_v9  ;;  %v1950_v14 = vadd.f32 %v1946_v11, %v1870_v6  ;;  %v2151_v15 = vpop.f32.mrf.mxu1 }
 0x367   : > { %v2051_v16 = vpop.f32.mrf.mxu0 }
 0x368   : > { %v2055_v18 = vadd.f32 %v2051_v16, %v1950_v14  ;;  %v2156_v19 = vadd.f32 %v2151_v15, %v2054_v13  ;;  %v2153_v20 = vpop.f32.mrf.mxu1 }
 0x369   : > { %v2253_v21 = vpop.f32.mrf.mxu0 }
 0x36a   : > { %v2157_v22 = vadd.f32 %v2153_v20, %v2055_v18  ;;  %v2258_v24 = vadd.f32 %v2253_v21, %v2156_v19 }
 0x36b   : > { %v2255_v23 = vpop.f32.mrf.mxu0 }
 0x36c   : > { %v2259_v30 = vadd.f32 %v2255_v23, %v2157_v22 }
 0x36d   : > { %v2355_v25 = vpop.f32.mrf.mxu1  ;;  %v2452_v26 = vpop.f32.mrf.mxu0 }
 0x36e   : > { %v2360_v41 = vadd.f32 %v2355_v25, %v2258_v24  ;;  %v2453_v48 = vadd.f32 %v2452_v26, %v2375_v28 }
 0x36f   : > { %v2357_v8 = vpop.f32.mrf.mxu1  ;;  %v2454_v45 = vpop.f32.mrf.mxu0 }
 0x370   : > { %v2368_v35 = vadd.f32 %v2366_v29, %v2360_v41  ;;  %v2361_v31 = vadd.f32 %v2357_v8, %v2259_v30  ;;  %v2455_v50 = vadd.f32 %v2454_v45, %v2375_v28 }
 0x372   : > { %v2457_v32 = vadd.f32 %v2453_v48, %v2368_v35  ;;  %v2369_v40 = vadd.f32 %v2366_v29, %v2361_v31 }
 0x374   : > { %2459 = vst [vmem:[%s406_s3] sm:$0xff] %v2457_v32  ;;  %v2458_v37 = vadd.f32 %v2455_v50, %v2369_v40 }
 0x376   : > { %2460 = vst [vmem:[%s406_s3 + $0x8] sm:$0xff] %v2458_v37 }
 0x377   : > { %2674 = shalt.err (!%p2671_p3)
}
 0x378   : > { %s2675_s28 = scalar_lea.hbm %s2474_s20, 256  ;;  %s2679_s19 = scalar_lea.hbm %s3285_s12, 512 }
 0x379   : > { %p2676_p4 = scmp.ne.s32.totalorder %s2474_s20, %s2675_s28  ;;  %p2680_p9 = scmp.lt.s32.totalorder %s2474_s20, %s3285_s12 }
 0x37a   : > { %p2681_p10 = scmp.lt.s32.totalorder %s2679_s19, %s2675_s28 }
 0x37b   : > { %p2677_p7 = pnand %p2676_p4, %p2838_p5 }
 0x37c   : > { %p2682_p11 = por %p2681_p10, %p2680_p9 }
 0x37d   : > { %p2678_p8 = pneg %p2677_p7 }
 0x37f   : > { %p2683_p12 = pnand %p2682_p11, %p2678_p8 }
 0x381   : > { %2686 = shalt.err (!%p2683_p12)
}
 0x382   : > { %2608 = dma.vmem_to_hbm [thread:$0]  (%p2838_p5), %s2477_s16, 256, %s2474_s20, %s2462_s30  }
 0x383 PF: > { %p2614_p13 = scmp.ge.s32.totalorder %s2721_s24, 2  ;;  %s2488_s18 = sand.u32 1, %s2709_s21  }
 0x384   : > { %s2489_s26 = scalar_lea.sflag [#allocation5], %s2488_s18 }
 0x385   : > { %p2611_p0 = pnand %p2614_p13, %p2842_p6 }
 0x387   : > { %p2612_p1 = pneg %p2611_p0 }
 0x389   : > { %2704 = dma.done.wait (%p2612_p1), %s2489_s26, 256  }
 0x38a   : > { %2706 = vsyncadd (%p2612_p1), %s2489_s26, 4294967040  ;;  %s3319_s25 = sld [smem:[#allocation7_spill]]  ;;  %p22_p2 = scmp.ge.s32.totalorder %s2825_s27, 4  }
 0x38b   : > { %s3320_s21 = smov %s2713_s22  ;;  %s3321_s22 = smov %s2717_s23 }
 0x38c   : > { %s3323_s24 = smov %s2825_s27  ;;  %24 = sbr.rel (!%p22_p2) target bundleno = 7 (0x7), region = 121 }
 0x390   : > { %s3322_s23 = smov %s3319_s25 }
 0x391   :  { %2494 = vsyncpa [#allocation5], 1 }
 0x392   :  { %2496 = vsyncpa [#allocation5 + $0x1], 1 }

</bundles_post_ra>
